<compile_context>
chip_gen: v6e
topology: v6e:2x2x1
jax: 0.10.0
libtpu: 0.0.40
codegen_flags: <defaults>
</compile_context>

<pallas_src>
import math
import functools

import jax
import jax.numpy as jnp
from jax.experimental import pallas as pl
from jax.experimental.pallas import tpu as pltpu


# ----------------------------------------------------------------------------
# Shared math helpers
# ----------------------------------------------------------------------------
def _layer_norm(x, gamma, beta, eps=1e-5):
    # Biased variance + eps inside rsqrt — matches torch.nn.LayerNorm defaults.
    mu = jnp.mean(x, axis=-1, keepdims=True)
    var = jnp.mean((x - mu) ** 2, axis=-1, keepdims=True)
    return (x - mu) * jax.lax.rsqrt(var + eps) * gamma + beta


def _block_diag_mask(batch, seq):
    """(N, N) additive mask: 0 within a batch element, -1e30 across batches."""
    n = batch * seq
    rb = jnp.arange(n, dtype=jnp.int32)[:, None] // seq
    cb = jnp.arange(n, dtype=jnp.int32)[None, :] // seq
    return jnp.where(rb == cb, 0.0, -1e30).astype(jnp.float32)


# ----------------------------------------------------------------------------
# Kernel (single invocation, no grid; layer loop statically unrolled)
# ----------------------------------------------------------------------------
def decoder_fused_kernel(
        x_ref, pe_ref, mask_ref,
        wqkv_ref, wo_ref, w1_ref, w2_ref, vecs_ref,
        wout_ref, bout_ref,
        o_ref,
        ctx_ref,                       # VMEM scratch: packed per-head context (N, D)
        *, batch, seq, num_heads, head_dim, ffn_dim, num_layers):
    D = num_heads * head_dim
    N = batch * seq
    F = ffn_dim

    # Positional-encoding add (pe broadcasts over batch), flatten to (N, D)
    # for every projection / FFN matmul (tile-aligned sublane merge: no-op).
    h = (x_ref[...] + pe_ref[...]).reshape(N, D)

    # Block-diagonal mask so the batch can be folded into flat (N, N) scores.
    mask = mask_ref[...]

    for l in range(num_layers):                       # static unroll (tiny NL)
        wqkv = wqkv_ref[l]                            # (D, 3D), 1/sqrt(Dh) folded into Q
        wo = wo_ref[l]                                # (D, D) packed over heads
        w1 = w1_ref[l]                                # (D, F)
        w2 = w2_ref[l]                                # (F, D)
        vecs = vecs_ref[l]                            # (8, P) packed small vectors
        bqkv = vecs[0:1, :3 * D]
        b1 = vecs[1:2, :F]
        bo = vecs[2:3, :D]
        g1 = vecs[3:4, :D]
        be1 = vecs[4:5, :D]
        g2 = vecs[5:6, :D]
        be2 = vecs[6:7, :D]
        b2 = vecs[7:8, :D]

        # ---- multi-head self-attention (fused QKV projection) --------------
        qkv = jnp.dot(h, wqkv, preferred_element_type=jnp.float32) + bqkv  # (N, 3D)
        for hd in range(num_heads):
            lo = hd * head_dim
            q = qkv[:, lo:lo + head_dim]                       # (N, Dh), pre-scaled
            k = qkv[:, D + lo:D + lo + head_dim]               # (N, Dh)
            v = qkv[:, 2 * D + lo:2 * D + lo + head_dim]       # (N, Dh)

            # flat (N, N) scores; q @ k^T without materializing a transpose
            s = jax.lax.dot_general(q, k, (((1,), (1,)), ((), ())),
                                    preferred_element_type=jnp.float32)
            s = s + mask
            s = s - jnp.max(s, axis=-1, keepdims=True)
            p = jnp.exp(s)
            p = p * pl.reciprocal(jnp.sum(p, axis=-1, keepdims=True), approx=True)

            # pack this head's context at its static lane offset
            ctx_ref[:, lo:lo + head_dim] = jnp.dot(
                p, v, preferred_element_type=jnp.float32)

        # one packed out-projection over all heads
        attn = jnp.dot(ctx_ref[...], wo, preferred_element_type=jnp.float32) + bo

        # residual + norm1 (post-norm)
        h1 = _layer_norm(h + attn, g1, be1)

        # ---- feed-forward (ReLU) --------------------------------------------
        ff = jnp.dot(h1, w1, preferred_element_type=jnp.float32) + b1
        ff = jnp.maximum(ff, 0.0)
        ff = jnp.dot(ff, w2, preferred_element_type=jnp.float32) + b2

        # residual + norm2
        h = _layer_norm(h1 + ff, g2, be2)

    # Final output projection; single store.
    o_ref[...] = (jnp.dot(h, wout_ref[...], preferred_element_type=jnp.float32)
                  + bout_ref[...])


# ----------------------------------------------------------------------------
# Wrapper
# ----------------------------------------------------------------------------
def decoder_forward(x, params, *, num_heads):
    """Mirrors Decoder.forward: (x + PE) -> N encoder layers -> Linear(D, L)."""
    B, T, D = x.shape
    assert D % num_heads == 0, "d_model must be divisible by num_heads"
    assert D % 2 == 0, "sine positional-encoding path assumes even d_model"
    N = B * T
    Dh = D // num_heads
    NL = params["wqkv"].shape[0]
    F = params["w1"].shape[-1]
    L = params["wout"].shape[-1]

    pe = params["pe"][:T]                       # (T, D); broadcast happens in-kernel
    mask = _block_diag_mask(B, T)               # constant-folded by XLA under jit

    kernel = functools.partial(
        decoder_fused_kernel, batch=B, seq=T, num_heads=num_heads,
        head_dim=Dh, ffn_dim=F, num_layers=NL)

    vmem = pl.BlockSpec(memory_space=pltpu.MemorySpace.VMEM)

    out2d = pl.pallas_call(
        kernel,
        out_shape=jax.ShapeDtypeStruct((N, L), jnp.float32),
        in_specs=[vmem] * 10,
        out_specs=vmem,
        scratch_shapes=[pltpu.VMEM((N, D), jnp.float32)],
    )(x, pe, mask,
      params["wqkv"], params["wo"], params["w1"], params["w2"], params["vecs"],
      params["wout"], params["bout"])

    return out2d.reshape(B, T, L)


# ----------------------------------------------------------------------------
# Pure-JAX reference (same param layout) for a correctness check
# ----------------------------------------------------------------------------
def decoder_reference(x, params, *, num_heads):
    B, T, D = x.shape
    H = num_heads
    Dh = D // H
    N = B * T
    NL = params["wqkv"].shape[0]
    F = params["w1"].shape[-1]
    hp = dict(preferred_element_type=jnp.float32,
              precision=jax.lax.Precision.HIGHEST)

    h = (x + params["pe"][:T]).reshape(N, D)
    mask = _block_diag_mask(B, T)

    for l in range(NL):
        vecs = params["vecs"][l]
        bqkv, b1, bo = vecs[0, :3 * D], vecs[1, :F], vecs[2, :D]
        g1, be1 = vecs[3, :D], vecs[4, :D]
        g2, be2 = vecs[5, :D], vecs[6, :D]
        b2 = vecs[7, :D]

        qkv = jnp.dot(h, params["wqkv"][l], **hp) + bqkv
        ctx = []
        for hd in range(H):
            lo = hd * Dh
            q = qkv[:, lo:lo + Dh]
            k = qkv[:, D + lo:D + lo + Dh]
            v = qkv[:, 2 * D + lo:2 * D + lo + Dh]
            s = jnp.dot(q, k.T, **hp) + mask
            p = jax.nn.softmax(s, axis=-1)
            ctx.append(jnp.dot(p, v, **hp))
        attn = jnp.dot(jnp.concatenate(ctx, axis=-1), params["wo"][l], **hp) + bo
        h1 = _layer_norm(h + attn, g1, be1)
        ff = jnp.maximum(jnp.dot(h1, params["w1"][l], **hp) + b1, 0.0)
        ff = jnp.dot(ff, params["w2"][l], **hp) + b2
        h = _layer_norm(h1 + ff, g2, be2)

    out = jnp.dot(h, params["wout"], **hp) + params["bout"]
    return out.reshape(B, T, -1)


# ----------------------------------------------------------------------------
# Parameters / positional encoding
# ----------------------------------------------------------------------------
def make_sine_pe(max_len, d_model):
    """Sine/cos PE identical to the PyTorch module (even d_model branch)."""
    position = jnp.arange(max_len, dtype=jnp.float32)[:, None]
    div_term = jnp.exp(jnp.arange(0, d_model, 2, dtype=jnp.float32)
                       * (-math.log(10000.0) / d_model))
    ang = position * div_term
    pe = jnp.zeros((max_len, d_model), jnp.float32)
    pe = pe.at[:, 0::2].set(jnp.sin(ang))
    pe = pe.at[:, 1::2].set(jnp.cos(ang))
    return pe                                          # (max_len, D)


def init_params(key, *, d_model, num_heads, num_layers, ffn_dim, out_dim, max_len):
    """Synthetic weights in kernel-friendly layout:
       - Linear weights pre-transposed to (in, out)
       - Wq|Wk|Wv fused into one (D, 3D) per layer; 1/sqrt(Dh) folded into Wq/bq
       - all tiny per-layer vectors packed into one (NL, 8, P) tile."""
    D, H, F, L, NL = d_model, num_heads, ffn_dim, out_dim, num_layers
    assert D % H == 0
    Dh = D // H
    inv_sqrt = 1.0 / math.sqrt(Dh)
    P = max(3 * D, F, D)                     # lane width of the packed-vector tile
    s = 0.05

    keys = iter(jax.random.split(key, NL * 12 + 2))

    wqkv, wo, w1, w2, vecs = [], [], [], [], []
    for _ in range(NL):
        wq_l = jax.random.normal(next(keys), (D, D), jnp.float32) * s
        wk_l = jax.random.normal(next(keys), (D, D), jnp.float32) * s
        wv_l = jax.random.normal(next(keys), (D, D), jnp.float32) * s
        wo_l = jax.random.normal(next(keys), (D, D), jnp.float32) * s
        w1_l = jax.random.normal(next(keys), (D, F), jnp.float32) * s
        w2_l = jax.random.normal(next(keys), (F, D), jnp.float32) * s
        bq_l = jax.random.normal(next(keys), (D,), jnp.float32) * s
        bk_l = jax.random.normal(next(keys), (D,), jnp.float32) * s
        bv_l = jax.random.normal(next(keys), (D,), jnp.float32) * s
        bo_l = jax.random.normal(next(keys), (D,), jnp.float32) * s
        b1_l = jax.random.normal(next(keys), (F,), jnp.float32) * s
        b2_l = jax.random.normal(next(keys), (D,), jnp.float32) * s

        # fused QKV weight with the softmax scale folded into the Q third
        wqkv.append(jnp.concatenate([wq_l * inv_sqrt, wk_l, wv_l], axis=1))  # (D,3D)
        wo.append(wo_l)
        w1.append(w1_l)
        w2.append(w2_l)

        v = jnp.zeros((8, P), jnp.float32)
        v = v.at[0, :3 * D].set(jnp.concatenate([bq_l * inv_sqrt, bk_l, bv_l]))
        v = v.at[1, :F].set(b1_l)
        v = v.at[2, :D].set(bo_l)
        v = v.at[3, :D].set(jnp.ones((D,), jnp.float32))    # ln1 gamma
        v = v.at[4, :D].set(jnp.zeros((D,), jnp.float32))   # ln1 beta
        v = v.at[5, :D].set(jnp.ones((D,), jnp.float32))    # ln2 gamma
        v = v.at[6, :D].set(jnp.zeros((D,), jnp.float32))   # ln2 beta
        v = v.at[7, :D].set(b2_l)
        vecs.append(v)

    params = {
        "wqkv": jnp.stack(wqkv),            # (NL, D, 3D)
        "wo": jnp.stack(wo),                # (NL, D, D)
        "w1": jnp.stack(w1),                # (NL, D, F)
        "w2": jnp.stack(w2),                # (NL, F, D)
        "vecs": jnp.stack(vecs),            # (NL, 8, P)
        "wout": jax.random.normal(next(keys), (D, L), jnp.float32) * s,
        "bout": jax.random.normal(next(keys), (1, L), jnp.float32) * s,
        "pe": make_sine_pe(max_len, D),     # (max_len, D)
    }
    return params


# ----------------------------------------------------------------------------
if __name__ == "__main__":
    # Shapes consistent with the module:
    #   Decoder(input_dim=32, L=16, num_heads=4, num_layers=2, feature_dim=64)
    #   input x: (batch=2, seq=8, input_dim=32)
    B, T = 2, 8
    d_model = 32          # input_dim (transformer d_model)
    num_heads = 4
    num_layers = 2
    feature_dim = 64      # dim_feedforward
    L = 16                # output_layer out features

    key = jax.random.PRNGKey(0)
    k_x, k_p = jax.random.split(key)
    x = jax.random.normal(k_x, (B, T, d_model), jnp.float32)
    params = init_params(k_p, d_model=d_model, num_heads=num_heads,
                         num_layers=num_layers, ffn_dim=feature_dim,
                         out_dim=L, max_len=64)

    fwd = jax.jit(functools.partial(decoder_forward, num_heads=num_heads))
    out = fwd(x, params)
    jax.block_until_ready(out)

    assert out.shape == (B, T, L)
    assert bool(jnp.all(jnp.isfinite(out)))

    # Numerical check against a pure-JAX reference with the same semantics.
    ref = decoder_reference(x, params, num_heads=num_heads)
    max_err = float(jnp.max(jnp.abs(out - ref)))
    assert max_err < 5e-2, f"mismatch vs reference: max |diff| = {max_err}"

    print("KERNEL_OK")
</pallas_src>

<mosaic_0001>
module attributes {stable_mosaic.version = 11 : i64} {
  func.func @decoder_fused_kernel(%arg0: memref<2x8x32xf32, #tpu.memory_space<vmem>>, %arg1: memref<8x32xf32, #tpu.memory_space<vmem>>, %arg2: memref<16x16xf32, #tpu.memory_space<vmem>>, %arg3: memref<2x32x96xf32, #tpu.memory_space<vmem>>, %arg4: memref<2x32x32xf32, #tpu.memory_space<vmem>>, %arg5: memref<2x32x64xf32, #tpu.memory_space<vmem>>, %arg6: memref<2x64x32xf32, #tpu.memory_space<vmem>>, %arg7: memref<2x8x96xf32, #tpu.memory_space<vmem>>, %arg8: memref<32x16xf32, #tpu.memory_space<vmem>>, %arg9: memref<1x16xf32, #tpu.memory_space<vmem>>, %arg10: memref<16x16xf32, #tpu.memory_space<vmem>>, %arg11: memref<16x32xf32, #tpu.memory_space<vmem>>) attributes {dimension_semantics = [], scalar_prefetch = 0 : i64, scratch_operands = 1 : i64, tpu.core_type = #tpu.core_type<tc>} {
    %c0 = arith.constant 0 : index
    %c0_0 = arith.constant 0 : index
    %c0_1 = arith.constant 0 : index
    %0 = vector.load %arg0[%c0, %c0_0, %c0_1] : memref<2x8x32xf32, #tpu.memory_space<vmem>>, vector<2x8x32xf32>
    %c0_2 = arith.constant 0 : index
    %c0_3 = arith.constant 0 : index
    %1 = vector.load %arg1[%c0_2, %c0_3] : memref<8x32xf32, #tpu.memory_space<vmem>>, vector<8x32xf32>
    %2 = vector.shape_cast %1 : vector<8x32xf32> to vector<1x8x32xf32>
    %3 = vector.broadcast %2 : vector<1x8x32xf32> to vector<2x8x32xf32>
    %4 = arith.addf %0, %3 : vector<2x8x32xf32>
    %5 = vector.shape_cast %4 : vector<2x8x32xf32> to vector<16x32xf32>
    %c0_4 = arith.constant 0 : index
    %c0_5 = arith.constant 0 : index
    %6 = vector.load %arg2[%c0_4, %c0_5] : memref<16x16xf32, #tpu.memory_space<vmem>>, vector<16x16xf32>
    %c0_6 = arith.constant 0 : index
    %c0_7 = arith.constant 0 : index
    %c0_8 = arith.constant 0 : index
    %7 = vector.load %arg3[%c0_6, %c0_7, %c0_8] : memref<2x32x96xf32, #tpu.memory_space<vmem>>, vector<1x32x96xf32>
    %8 = vector.shape_cast %7 : vector<1x32x96xf32> to vector<32x96xf32>
    %c0_9 = arith.constant 0 : index
    %c0_10 = arith.constant 0 : index
    %c0_11 = arith.constant 0 : index
    %9 = vector.load %arg4[%c0_9, %c0_10, %c0_11] : memref<2x32x32xf32, #tpu.memory_space<vmem>>, vector<1x32x32xf32>
    %10 = vector.shape_cast %9 : vector<1x32x32xf32> to vector<32x32xf32>
    %c0_12 = arith.constant 0 : index
    %c0_13 = arith.constant 0 : index
    %c0_14 = arith.constant 0 : index
    %11 = vector.load %arg5[%c0_12, %c0_13, %c0_14] : memref<2x32x64xf32, #tpu.memory_space<vmem>>, vector<1x32x64xf32>
    %12 = vector.shape_cast %11 : vector<1x32x64xf32> to vector<32x64xf32>
    %c0_15 = arith.constant 0 : index
    %c0_16 = arith.constant 0 : index
    %c0_17 = arith.constant 0 : index
    %13 = vector.load %arg6[%c0_15, %c0_16, %c0_17] : memref<2x64x32xf32, #tpu.memory_space<vmem>>, vector<1x64x32xf32>
    %14 = vector.shape_cast %13 : vector<1x64x32xf32> to vector<64x32xf32>
    %c0_18 = arith.constant 0 : index
    %c0_19 = arith.constant 0 : index
    %c0_20 = arith.constant 0 : index
    %15 = vector.load %arg7[%c0_18, %c0_19, %c0_20] : memref<2x8x96xf32, #tpu.memory_space<vmem>>, vector<1x8x96xf32>
    %16 = vector.shape_cast %15 : vector<1x8x96xf32> to vector<8x96xf32>
    %17 = vector.extract_strided_slice %16 {offsets = [0, 0], sizes = [1, 96], strides = [1, 1]} : vector<8x96xf32> to vector<1x96xf32>
    %18 = vector.extract_strided_slice %16 {offsets = [1, 0], sizes = [1, 64], strides = [1, 1]} : vector<8x96xf32> to vector<1x64xf32>
    %19 = vector.extract_strided_slice %16 {offsets = [2, 0], sizes = [1, 32], strides = [1, 1]} : vector<8x96xf32> to vector<1x32xf32>
    %20 = vector.extract_strided_slice %16 {offsets = [3, 0], sizes = [1, 32], strides = [1, 1]} : vector<8x96xf32> to vector<1x32xf32>
    %21 = vector.extract_strided_slice %16 {offsets = [4, 0], sizes = [1, 32], strides = [1, 1]} : vector<8x96xf32> to vector<1x32xf32>
    %22 = vector.extract_strided_slice %16 {offsets = [5, 0], sizes = [1, 32], strides = [1, 1]} : vector<8x96xf32> to vector<1x32xf32>
    %23 = vector.extract_strided_slice %16 {offsets = [6, 0], sizes = [1, 32], strides = [1, 1]} : vector<8x96xf32> to vector<1x32xf32>
    %24 = vector.extract_strided_slice %16 {offsets = [7, 0], sizes = [1, 32], strides = [1, 1]} : vector<8x96xf32> to vector<1x32xf32>
    %cst = arith.constant dense<0.000000e+00> : vector<16x96xf32>
    %25 = tpu.matmul %5, %8, %cst {dimension_numbers = #tpu.dot_dimension_numbers<[1], [0], [0], [1], [0, 0, 1, 1], [], []>} : vector<16x32xf32>, vector<32x96xf32>, vector<16x96xf32> -> vector<16x96xf32>
    %26 = vector.broadcast %17 : vector<1x96xf32> to vector<16x96xf32>
    %27 = arith.addf %25, %26 : vector<16x96xf32>
    %28 = vector.extract_strided_slice %27 {offsets = [0, 0], sizes = [16, 8], strides = [1, 1]} : vector<16x96xf32> to vector<16x8xf32>
    %29 = vector.extract_strided_slice %27 {offsets = [0, 32], sizes = [16, 8], strides = [1, 1]} : vector<16x96xf32> to vector<16x8xf32>
    %30 = vector.extract_strided_slice %27 {offsets = [0, 64], sizes = [16, 8], strides = [1, 1]} : vector<16x96xf32> to vector<16x8xf32>
    %cst_21 = arith.constant dense<0.000000e+00> : vector<16x16xf32>
    %31 = tpu.matmul %28, %29, %cst_21 {dimension_numbers = #tpu.dot_dimension_numbers<[1], [1], [0], [0], [0, 0, 1, 0], [], []>} : vector<16x8xf32>, vector<16x8xf32>, vector<16x16xf32> -> vector<16x16xf32>
    %32 = arith.addf %31, %6 : vector<16x16xf32>
    %cst_22 = arith.constant dense<0xFF800000> : vector<16xf32>
    %33 = vector.multi_reduction <maximumf>, %32, %cst_22 [1] : vector<16x16xf32> to vector<16xf32>
    %34 = vector.shape_cast %33 : vector<16xf32> to vector<16x1xf32>
    %35 = vector.broadcast %34 : vector<16x1xf32> to vector<16x16xf32>
    %36 = arith.subf %32, %35 : vector<16x16xf32>
    %37 = math.exp %36 : vector<16x16xf32>
    %cst_23 = arith.constant dense<0.000000e+00> : vector<16xf32>
    %38 = vector.multi_reduction <add>, %37, %cst_23 [1] : vector<16x16xf32> to vector<16xf32>
    %39 = vector.shape_cast %38 : vector<16xf32> to vector<16x1xf32>
    %40 = tpu.reciprocal %39 {approx = true} : vector<16x1xf32> -> vector<16x1xf32>
    %41 = vector.broadcast %40 : vector<16x1xf32> to vector<16x16xf32>
    %42 = arith.mulf %37, %41 : vector<16x16xf32>
    %cst_24 = arith.constant dense<0.000000e+00> : vector<16x8xf32>
    %43 = tpu.matmul %42, %30, %cst_24 {dimension_numbers = #tpu.dot_dimension_numbers<[1], [0], [0], [1], [0, 0, 1, 1], [], []>} : vector<16x16xf32>, vector<16x8xf32>, vector<16x8xf32> -> vector<16x8xf32>
    %c0_25 = arith.constant 0 : index
    %c0_26 = arith.constant 0 : index
    %44 = vector.load %arg11[%c0_25, %c0_26] : memref<16x32xf32, #tpu.memory_space<vmem>>, vector<16x8xf32>
    tpu.vector_store %arg11[%c0_25, %c0_26], %43 {strides = array<i32>} : memref<16x32xf32, #tpu.memory_space<vmem>>, vector<16x8xf32>,
    %45 = vector.extract_strided_slice %27 {offsets = [0, 8], sizes = [16, 8], strides = [1, 1]} : vector<16x96xf32> to vector<16x8xf32>
    %46 = vector.extract_strided_slice %27 {offsets = [0, 40], sizes = [16, 8], strides = [1, 1]} : vector<16x96xf32> to vector<16x8xf32>
    %47 = vector.extract_strided_slice %27 {offsets = [0, 72], sizes = [16, 8], strides = [1, 1]} : vector<16x96xf32> to vector<16x8xf32>
    %cst_27 = arith.constant dense<0.000000e+00> : vector<16x16xf32>
    %48 = tpu.matmul %45, %46, %cst_27 {dimension_numbers = #tpu.dot_dimension_numbers<[1], [1], [0], [0], [0, 0, 1, 0], [], []>} : vector<16x8xf32>, vector<16x8xf32>, vector<16x16xf32> -> vector<16x16xf32>
    %49 = arith.addf %48, %6 : vector<16x16xf32>
    %cst_28 = arith.constant dense<0xFF800000> : vector<16xf32>
    %50 = vector.multi_reduction <maximumf>, %49, %cst_28 [1] : vector<16x16xf32> to vector<16xf32>
    %51 = vector.shape_cast %50 : vector<16xf32> to vector<16x1xf32>
    %52 = vector.broadcast %51 : vector<16x1xf32> to vector<16x16xf32>
    %53 = arith.subf %49, %52 : vector<16x16xf32>
    %54 = math.exp %53 : vector<16x16xf32>
    %cst_29 = arith.constant dense<0.000000e+00> : vector<16xf32>
    %55 = vector.multi_reduction <add>, %54, %cst_29 [1] : vector<16x16xf32> to vector<16xf32>
    %56 = vector.shape_cast %55 : vector<16xf32> to vector<16x1xf32>
    %57 = tpu.reciprocal %56 {approx = true} : vector<16x1xf32> -> vector<16x1xf32>
    %58 = vector.broadcast %57 : vector<16x1xf32> to vector<16x16xf32>
    %59 = arith.mulf %54, %58 : vector<16x16xf32>
    %cst_30 = arith.constant dense<0.000000e+00> : vector<16x8xf32>
    %60 = tpu.matmul %59, %47, %cst_30 {dimension_numbers = #tpu.dot_dimension_numbers<[1], [0], [0], [1], [0, 0, 1, 1], [], []>} : vector<16x16xf32>, vector<16x8xf32>, vector<16x8xf32> -> vector<16x8xf32>
    %c0_31 = arith.constant 0 : index
    %c8 = arith.constant 8 : index
    %61 = vector.load %arg11[%c0_31, %c8] : memref<16x32xf32, #tpu.memory_space<vmem>>, vector<16x8xf32>
    tpu.vector_store %arg11[%c0_31, %c8], %60 {strides = array<i32>} : memref<16x32xf32, #tpu.memory_space<vmem>>, vector<16x8xf32>,
    %62 = vector.extract_strided_slice %27 {offsets = [0, 16], sizes = [16, 8], strides = [1, 1]} : vector<16x96xf32> to vector<16x8xf32>
    %63 = vector.extract_strided_slice %27 {offsets = [0, 48], sizes = [16, 8], strides = [1, 1]} : vector<16x96xf32> to vector<16x8xf32>
    %64 = vector.extract_strided_slice %27 {offsets = [0, 80], sizes = [16, 8], strides = [1, 1]} : vector<16x96xf32> to vector<16x8xf32>
    %cst_32 = arith.constant dense<0.000000e+00> : vector<16x16xf32>
    %65 = tpu.matmul %62, %63, %cst_32 {dimension_numbers = #tpu.dot_dimension_numbers<[1], [1], [0], [0], [0, 0, 1, 0], [], []>} : vector<16x8xf32>, vector<16x8xf32>, vector<16x16xf32> -> vector<16x16xf32>
    %66 = arith.addf %65, %6 : vector<16x16xf32>
    %cst_33 = arith.constant dense<0xFF800000> : vector<16xf32>
    %67 = vector.multi_reduction <maximumf>, %66, %cst_33 [1] : vector<16x16xf32> to vector<16xf32>
    %68 = vector.shape_cast %67 : vector<16xf32> to vector<16x1xf32>
    %69 = vector.broadcast %68 : vector<16x1xf32> to vector<16x16xf32>
    %70 = arith.subf %66, %69 : vector<16x16xf32>
    %71 = math.exp %70 : vector<16x16xf32>
    %cst_34 = arith.constant dense<0.000000e+00> : vector<16xf32>
    %72 = vector.multi_reduction <add>, %71, %cst_34 [1] : vector<16x16xf32> to vector<16xf32>
    %73 = vector.shape_cast %72 : vector<16xf32> to vector<16x1xf32>
    %74 = tpu.reciprocal %73 {approx = true} : vector<16x1xf32> -> vector<16x1xf32>
    %75 = vector.broadcast %74 : vector<16x1xf32> to vector<16x16xf32>
    %76 = arith.mulf %71, %75 : vector<16x16xf32>
    %cst_35 = arith.constant dense<0.000000e+00> : vector<16x8xf32>
    %77 = tpu.matmul %76, %64, %cst_35 {dimension_numbers = #tpu.dot_dimension_numbers<[1], [0], [0], [1], [0, 0, 1, 1], [], []>} : vector<16x16xf32>, vector<16x8xf32>, vector<16x8xf32> -> vector<16x8xf32>
    %c0_36 = arith.constant 0 : index
    %c16 = arith.constant 16 : index
    %78 = vector.load %arg11[%c0_36, %c16] : memref<16x32xf32, #tpu.memory_space<vmem>>, vector<16x8xf32>
    tpu.vector_store %arg11[%c0_36, %c16], %77 {strides = array<i32>} : memref<16x32xf32, #tpu.memory_space<vmem>>, vector<16x8xf32>,
    %79 = vector.extract_strided_slice %27 {offsets = [0, 24], sizes = [16, 8], strides = [1, 1]} : vector<16x96xf32> to vector<16x8xf32>
    %80 = vector.extract_strided_slice %27 {offsets = [0, 56], sizes = [16, 8], strides = [1, 1]} : vector<16x96xf32> to vector<16x8xf32>
    %81 = vector.extract_strided_slice %27 {offsets = [0, 88], sizes = [16, 8], strides = [1, 1]} : vector<16x96xf32> to vector<16x8xf32>
    %cst_37 = arith.constant dense<0.000000e+00> : vector<16x16xf32>
    %82 = tpu.matmul %79, %80, %cst_37 {dimension_numbers = #tpu.dot_dimension_numbers<[1], [1], [0], [0], [0, 0, 1, 0], [], []>} : vector<16x8xf32>, vector<16x8xf32>, vector<16x16xf32> -> vector<16x16xf32>
    %83 = arith.addf %82, %6 : vector<16x16xf32>
    %cst_38 = arith.constant dense<0xFF800000> : vector<16xf32>
    %84 = vector.multi_reduction <maximumf>, %83, %cst_38 [1] : vector<16x16xf32> to vector<16xf32>
    %85 = vector.shape_cast %84 : vector<16xf32> to vector<16x1xf32>
    %86 = vector.broadcast %85 : vector<16x1xf32> to vector<16x16xf32>
    %87 = arith.subf %83, %86 : vector<16x16xf32>
    %88 = math.exp %87 : vector<16x16xf32>
    %cst_39 = arith.constant dense<0.000000e+00> : vector<16xf32>
    %89 = vector.multi_reduction <add>, %88, %cst_39 [1] : vector<16x16xf32> to vector<16xf32>
    %90 = vector.shape_cast %89 : vector<16xf32> to vector<16x1xf32>
    %91 = tpu.reciprocal %90 {approx = true} : vector<16x1xf32> -> vector<16x1xf32>
    %92 = vector.broadcast %91 : vector<16x1xf32> to vector<16x16xf32>
    %93 = arith.mulf %88, %92 : vector<16x16xf32>
    %cst_40 = arith.constant dense<0.000000e+00> : vector<16x8xf32>
    %94 = tpu.matmul %93, %81, %cst_40 {dimension_numbers = #tpu.dot_dimension_numbers<[1], [0], [0], [1], [0, 0, 1, 1], [], []>} : vector<16x16xf32>, vector<16x8xf32>, vector<16x8xf32> -> vector<16x8xf32>
    %c0_41 = arith.constant 0 : index
    %c24 = arith.constant 24 : index
    %95 = vector.load %arg11[%c0_41, %c24] : memref<16x32xf32, #tpu.memory_space<vmem>>, vector<16x8xf32>
    tpu.vector_store %arg11[%c0_41, %c24], %94 {strides = array<i32>} : memref<16x32xf32, #tpu.memory_space<vmem>>, vector<16x8xf32>,
    %c0_42 = arith.constant 0 : index
    %c0_43 = arith.constant 0 : index
    %96 = vector.load %arg11[%c0_42, %c0_43] : memref<16x32xf32, #tpu.memory_space<vmem>>, vector<16x32xf32>
    %cst_44 = arith.constant dense<0.000000e+00> : vector<16x32xf32>
    %97 = tpu.matmul %96, %10, %cst_44 {dimension_numbers = #tpu.dot_dimension_numbers<[1], [0], [0], [1], [0, 0, 1, 1], [], []>} : vector<16x32xf32>, vector<32x32xf32>, vector<16x32xf32> -> vector<16x32xf32>
    %98 = vector.broadcast %19 : vector<1x32xf32> to vector<16x32xf32>
    %99 = arith.addf %97, %98 : vector<16x32xf32>
    %100 = arith.addf %5, %99 : vector<16x32xf32>
    %cst_45 = arith.constant dense<0.000000e+00> : vector<16xf32>
    %101 = vector.multi_reduction <add>, %100, %cst_45 [1] : vector<16x32xf32> to vector<16xf32>
    %102 = vector.shape_cast %101 : vector<16xf32> to vector<16x1xf32>
    %cst_46 = arith.constant 3.200000e+01 : f32
    %103 = vector.broadcast %cst_46 : f32 to vector<16x1xf32>
    %104 = arith.divf %102, %103 : vector<16x1xf32>
    %105 = vector.broadcast %104 : vector<16x1xf32> to vector<16x32xf32>
    %106 = arith.subf %100, %105 : vector<16x32xf32>
    %107 = arith.mulf %106, %106 : vector<16x32xf32>
    %cst_47 = arith.constant dense<0.000000e+00> : vector<16xf32>
    %108 = vector.multi_reduction <add>, %107, %cst_47 [1] : vector<16x32xf32> to vector<16xf32>
    %109 = vector.shape_cast %108 : vector<16xf32> to vector<16x1xf32>
    %cst_48 = arith.constant 3.200000e+01 : f32
    %110 = vector.broadcast %cst_48 : f32 to vector<16x1xf32>
    %111 = arith.divf %109, %110 : vector<16x1xf32>
    %112 = vector.broadcast %104 : vector<16x1xf32> to vector<16x32xf32>
    %113 = arith.subf %100, %112 : vector<16x32xf32>
    %cst_49 = arith.constant 9.99999974E-6 : f32
    %114 = vector.broadcast %cst_49 : f32 to vector<16x1xf32>
    %115 = arith.addf %111, %114 : vector<16x1xf32>
    %116 = math.rsqrt %115 : vector<16x1xf32>
    %117 = vector.broadcast %116 : vector<16x1xf32> to vector<16x32xf32>
    %118 = arith.mulf %113, %117 : vector<16x32xf32>
    %119 = vector.broadcast %20 : vector<1x32xf32> to vector<16x32xf32>
    %120 = arith.mulf %118, %119 : vector<16x32xf32>
    %121 = vector.broadcast %21 : vector<1x32xf32> to vector<16x32xf32>
    %122 = arith.addf %120, %121 : vector<16x32xf32>
    %cst_50 = arith.constant dense<0.000000e+00> : vector<16x64xf32>
    %123 = tpu.matmul %122, %12, %cst_50 {dimension_numbers = #tpu.dot_dimension_numbers<[1], [0], [0], [1], [0, 0, 1, 1], [], []>} : vector<16x32xf32>, vector<32x64xf32>, vector<16x64xf32> -> vector<16x64xf32>
    %124 = vector.broadcast %18 : vector<1x64xf32> to vector<16x64xf32>
    %125 = arith.addf %123, %124 : vector<16x64xf32>
    %cst_51 = arith.constant 0.000000e+00 : f32
    %126 = vector.broadcast %cst_51 : f32 to vector<16x64xf32>
    %127 = arith.maximumf %125, %126 : vector<16x64xf32>
    %cst_52 = arith.constant dense<0.000000e+00> : vector<16x32xf32>
    %128 = tpu.matmul %127, %14, %cst_52 {dimension_numbers = #tpu.dot_dimension_numbers<[1], [0], [0], [1], [0, 0, 1, 1], [], []>} : vector<16x64xf32>, vector<64x32xf32>, vector<16x32xf32> -> vector<16x32xf32>
    %129 = vector.broadcast %24 : vector<1x32xf32> to vector<16x32xf32>
    %130 = arith.addf %128, %129 : vector<16x32xf32>
    %131 = arith.addf %122, %130 : vector<16x32xf32>
    %cst_53 = arith.constant dense<0.000000e+00> : vector<16xf32>
    %132 = vector.multi_reduction <add>, %131, %cst_53 [1] : vector<16x32xf32> to vector<16xf32>
    %133 = vector.shape_cast %132 : vector<16xf32> to vector<16x1xf32>
    %cst_54 = arith.constant 3.200000e+01 : f32
    %134 = vector.broadcast %cst_54 : f32 to vector<16x1xf32>
    %135 = arith.divf %133, %134 : vector<16x1xf32>
    %136 = vector.broadcast %135 : vector<16x1xf32> to vector<16x32xf32>
    %137 = arith.subf %131, %136 : vector<16x32xf32>
    %138 = arith.mulf %137, %137 : vector<16x32xf32>
    %cst_55 = arith.constant dense<0.000000e+00> : vector<16xf32>
    %139 = vector.multi_reduction <add>, %138, %cst_55 [1] : vector<16x32xf32> to vector<16xf32>
    %140 = vector.shape_cast %139 : vector<16xf32> to vector<16x1xf32>
    %cst_56 = arith.constant 3.200000e+01 : f32
    %141 = vector.broadcast %cst_56 : f32 to vector<16x1xf32>
    %142 = arith.divf %140, %141 : vector<16x1xf32>
    %143 = vector.broadcast %135 : vector<16x1xf32> to vector<16x32xf32>
    %144 = arith.subf %131, %143 : vector<16x32xf32>
    %cst_57 = arith.constant 9.99999974E-6 : f32
    %145 = vector.broadcast %cst_57 : f32 to vector<16x1xf32>
    %146 = arith.addf %142, %145 : vector<16x1xf32>
    %147 = math.rsqrt %146 : vector<16x1xf32>
    %148 = vector.broadcast %147 : vector<16x1xf32> to vector<16x32xf32>
    %149 = arith.mulf %144, %148 : vector<16x32xf32>
    %150 = vector.broadcast %22 : vector<1x32xf32> to vector<16x32xf32>
    %151 = arith.mulf %149, %150 : vector<16x32xf32>
    %152 = vector.broadcast %23 : vector<1x32xf32> to vector<16x32xf32>
    %153 = arith.addf %151, %152 : vector<16x32xf32>
    %c1 = arith.constant 1 : index
    %c0_58 = arith.constant 0 : index
    %c0_59 = arith.constant 0 : index
    %154 = vector.load %arg3[%c1, %c0_58, %c0_59] : memref<2x32x96xf32, #tpu.memory_space<vmem>>, vector<1x32x96xf32>
    %155 = vector.shape_cast %154 : vector<1x32x96xf32> to vector<32x96xf32>
    %c1_60 = arith.constant 1 : index
    %c0_61 = arith.constant 0 : index
    %c0_62 = arith.constant 0 : index
    %156 = vector.load %arg4[%c1_60, %c0_61, %c0_62] : memref<2x32x32xf32, #tpu.memory_space<vmem>>, vector<1x32x32xf32>
    %157 = vector.shape_cast %156 : vector<1x32x32xf32> to vector<32x32xf32>
    %c1_63 = arith.constant 1 : index
    %c0_64 = arith.constant 0 : index
    %c0_65 = arith.constant 0 : index
    %158 = vector.load %arg5[%c1_63, %c0_64, %c0_65] : memref<2x32x64xf32, #tpu.memory_space<vmem>>, vector<1x32x64xf32>
    %159 = vector.shape_cast %158 : vector<1x32x64xf32> to vector<32x64xf32>
    %c1_66 = arith.constant 1 : index
    %c0_67 = arith.constant 0 : index
    %c0_68 = arith.constant 0 : index
    %160 = vector.load %arg6[%c1_66, %c0_67, %c0_68] : memref<2x64x32xf32, #tpu.memory_space<vmem>>, vector<1x64x32xf32>
    %161 = vector.shape_cast %160 : vector<1x64x32xf32> to vector<64x32xf32>
    %c1_69 = arith.constant 1 : index
    %c0_70 = arith.constant 0 : index
    %c0_71 = arith.constant 0 : index
    %162 = vector.load %arg7[%c1_69, %c0_70, %c0_71] : memref<2x8x96xf32, #tpu.memory_space<vmem>>, vector<1x8x96xf32>
    %163 = vector.shape_cast %162 : vector<1x8x96xf32> to vector<8x96xf32>
    %164 = vector.extract_strided_slice %163 {offsets = [0, 0], sizes = [1, 96], strides = [1, 1]} : vector<8x96xf32> to vector<1x96xf32>
    %165 = vector.extract_strided_slice %163 {offsets = [1, 0], sizes = [1, 64], strides = [1, 1]} : vector<8x96xf32> to vector<1x64xf32>
    %166 = vector.extract_strided_slice %163 {offsets = [2, 0], sizes = [1, 32], strides = [1, 1]} : vector<8x96xf32> to vector<1x32xf32>
    %167 = vector.extract_strided_slice %163 {offsets = [3, 0], sizes = [1, 32], strides = [1, 1]} : vector<8x96xf32> to vector<1x32xf32>
    %168 = vector.extract_strided_slice %163 {offsets = [4, 0], sizes = [1, 32], strides = [1, 1]} : vector<8x96xf32> to vector<1x32xf32>
    %169 = vector.extract_strided_slice %163 {offsets = [5, 0], sizes = [1, 32], strides = [1, 1]} : vector<8x96xf32> to vector<1x32xf32>
    %170 = vector.extract_strided_slice %163 {offsets = [6, 0], sizes = [1, 32], strides = [1, 1]} : vector<8x96xf32> to vector<1x32xf32>
    %171 = vector.extract_strided_slice %163 {offsets = [7, 0], sizes = [1, 32], strides = [1, 1]} : vector<8x96xf32> to vector<1x32xf32>
    %cst_72 = arith.constant dense<0.000000e+00> : vector<16x96xf32>
    %172 = tpu.matmul %153, %155, %cst_72 {dimension_numbers = #tpu.dot_dimension_numbers<[1], [0], [0], [1], [0, 0, 1, 1], [], []>} : vector<16x32xf32>, vector<32x96xf32>, vector<16x96xf32> -> vector<16x96xf32>
    %173 = vector.broadcast %164 : vector<1x96xf32> to vector<16x96xf32>
    %174 = arith.addf %172, %173 : vector<16x96xf32>
    %175 = vector.extract_strided_slice %174 {offsets = [0, 0], sizes = [16, 8], strides = [1, 1]} : vector<16x96xf32> to vector<16x8xf32>
    %176 = vector.extract_strided_slice %174 {offsets = [0, 32], sizes = [16, 8], strides = [1, 1]} : vector<16x96xf32> to vector<16x8xf32>
    %177 = vector.extract_strided_slice %174 {offsets = [0, 64], sizes = [16, 8], strides = [1, 1]} : vector<16x96xf32> to vector<16x8xf32>
    %cst_73 = arith.constant dense<0.000000e+00> : vector<16x16xf32>
    %178 = tpu.matmul %175, %176, %cst_73 {dimension_numbers = #tpu.dot_dimension_numbers<[1], [1], [0], [0], [0, 0, 1, 0], [], []>} : vector<16x8xf32>, vector<16x8xf32>, vector<16x16xf32> -> vector<16x16xf32>
    %179 = arith.addf %178, %6 : vector<16x16xf32>
    %cst_74 = arith.constant dense<0xFF800000> : vector<16xf32>
    %180 = vector.multi_reduction <maximumf>, %179, %cst_74 [1] : vector<16x16xf32> to vector<16xf32>
    %181 = vector.shape_cast %180 : vector<16xf32> to vector<16x1xf32>
    %182 = vector.broadcast %181 : vector<16x1xf32> to vector<16x16xf32>
    %183 = arith.subf %179, %182 : vector<16x16xf32>
    %184 = math.exp %183 : vector<16x16xf32>
    %cst_75 = arith.constant dense<0.000000e+00> : vector<16xf32>
    %185 = vector.multi_reduction <add>, %184, %cst_75 [1] : vector<16x16xf32> to vector<16xf32>
    %186 = vector.shape_cast %185 : vector<16xf32> to vector<16x1xf32>
    %187 = tpu.reciprocal %186 {approx = true} : vector<16x1xf32> -> vector<16x1xf32>
    %188 = vector.broadcast %187 : vector<16x1xf32> to vector<16x16xf32>
    %189 = arith.mulf %184, %188 : vector<16x16xf32>
    %cst_76 = arith.constant dense<0.000000e+00> : vector<16x8xf32>
    %190 = tpu.matmul %189, %177, %cst_76 {dimension_numbers = #tpu.dot_dimension_numbers<[1], [0], [0], [1], [0, 0, 1, 1], [], []>} : vector<16x16xf32>, vector<16x8xf32>, vector<16x8xf32> -> vector<16x8xf32>
    %c0_77 = arith.constant 0 : index
    %c0_78 = arith.constant 0 : index
    %191 = vector.load %arg11[%c0_77, %c0_78] : memref<16x32xf32, #tpu.memory_space<vmem>>, vector<16x8xf32>
    tpu.vector_store %arg11[%c0_77, %c0_78], %190 {strides = array<i32>} : memref<16x32xf32, #tpu.memory_space<vmem>>, vector<16x8xf32>,
    %192 = vector.extract_strided_slice %174 {offsets = [0, 8], sizes = [16, 8], strides = [1, 1]} : vector<16x96xf32> to vector<16x8xf32>
    %193 = vector.extract_strided_slice %174 {offsets = [0, 40], sizes = [16, 8], strides = [1, 1]} : vector<16x96xf32> to vector<16x8xf32>
    %194 = vector.extract_strided_slice %174 {offsets = [0, 72], sizes = [16, 8], strides = [1, 1]} : vector<16x96xf32> to vector<16x8xf32>
    %cst_79 = arith.constant dense<0.000000e+00> : vector<16x16xf32>
    %195 = tpu.matmul %192, %193, %cst_79 {dimension_numbers = #tpu.dot_dimension_numbers<[1], [1], [0], [0], [0, 0, 1, 0], [], []>} : vector<16x8xf32>, vector<16x8xf32>, vector<16x16xf32> -> vector<16x16xf32>
    %196 = arith.addf %195, %6 : vector<16x16xf32>
    %cst_80 = arith.constant dense<0xFF800000> : vector<16xf32>
    %197 = vector.multi_reduction <maximumf>, %196, %cst_80 [1] : vector<16x16xf32> to vector<16xf32>
    %198 = vector.shape_cast %197 : vector<16xf32> to vector<16x1xf32>
    %199 = vector.broadcast %198 : vector<16x1xf32> to vector<16x16xf32>
    %200 = arith.subf %196, %199 : vector<16x16xf32>
    %201 = math.exp %200 : vector<16x16xf32>
    %cst_81 = arith.constant dense<0.000000e+00> : vector<16xf32>
    %202 = vector.multi_reduction <add>, %201, %cst_81 [1] : vector<16x16xf32> to vector<16xf32>
    %203 = vector.shape_cast %202 : vector<16xf32> to vector<16x1xf32>
    %204 = tpu.reciprocal %203 {approx = true} : vector<16x1xf32> -> vector<16x1xf32>
    %205 = vector.broadcast %204 : vector<16x1xf32> to vector<16x16xf32>
    %206 = arith.mulf %201, %205 : vector<16x16xf32>
    %cst_82 = arith.constant dense<0.000000e+00> : vector<16x8xf32>
    %207 = tpu.matmul %206, %194, %cst_82 {dimension_numbers = #tpu.dot_dimension_numbers<[1], [0], [0], [1], [0, 0, 1, 1], [], []>} : vector<16x16xf32>, vector<16x8xf32>, vector<16x8xf32> -> vector<16x8xf32>
    %c0_83 = arith.constant 0 : index
    %c8_84 = arith.constant 8 : index
    %208 = vector.load %arg11[%c0_83, %c8_84] : memref<16x32xf32, #tpu.memory_space<vmem>>, vector<16x8xf32>
    tpu.vector_store %arg11[%c0_83, %c8_84], %207 {strides = array<i32>} : memref<16x32xf32, #tpu.memory_space<vmem>>, vector<16x8xf32>,
    %209 = vector.extract_strided_slice %174 {offsets = [0, 16], sizes = [16, 8], strides = [1, 1]} : vector<16x96xf32> to vector<16x8xf32>
    %210 = vector.extract_strided_slice %174 {offsets = [0, 48], sizes = [16, 8], strides = [1, 1]} : vector<16x96xf32> to vector<16x8xf32>
    %211 = vector.extract_strided_slice %174 {offsets = [0, 80], sizes = [16, 8], strides = [1, 1]} : vector<16x96xf32> to vector<16x8xf32>
    %cst_85 = arith.constant dense<0.000000e+00> : vector<16x16xf32>
    %212 = tpu.matmul %209, %210, %cst_85 {dimension_numbers = #tpu.dot_dimension_numbers<[1], [1], [0], [0], [0, 0, 1, 0], [], []>} : vector<16x8xf32>, vector<16x8xf32>, vector<16x16xf32> -> vector<16x16xf32>
    %213 = arith.addf %212, %6 : vector<16x16xf32>
    %cst_86 = arith.constant dense<0xFF800000> : vector<16xf32>
    %214 = vector.multi_reduction <maximumf>, %213, %cst_86 [1] : vector<16x16xf32> to vector<16xf32>
    %215 = vector.shape_cast %214 : vector<16xf32> to vector<16x1xf32>
    %216 = vector.broadcast %215 : vector<16x1xf32> to vector<16x16xf32>
    %217 = arith.subf %213, %216 : vector<16x16xf32>
    %218 = math.exp %217 : vector<16x16xf32>
    %cst_87 = arith.constant dense<0.000000e+00> : vector<16xf32>
    %219 = vector.multi_reduction <add>, %218, %cst_87 [1] : vector<16x16xf32> to vector<16xf32>
    %220 = vector.shape_cast %219 : vector<16xf32> to vector<16x1xf32>
    %221 = tpu.reciprocal %220 {approx = true} : vector<16x1xf32> -> vector<16x1xf32>
    %222 = vector.broadcast %221 : vector<16x1xf32> to vector<16x16xf32>
    %223 = arith.mulf %218, %222 : vector<16x16xf32>
    %cst_88 = arith.constant dense<0.000000e+00> : vector<16x8xf32>
    %224 = tpu.matmul %223, %211, %cst_88 {dimension_numbers = #tpu.dot_dimension_numbers<[1], [0], [0], [1], [0, 0, 1, 1], [], []>} : vector<16x16xf32>, vector<16x8xf32>, vector<16x8xf32> -> vector<16x8xf32>
    %c0_89 = arith.constant 0 : index
    %c16_90 = arith.constant 16 : index
    %225 = vector.load %arg11[%c0_89, %c16_90] : memref<16x32xf32, #tpu.memory_space<vmem>>, vector<16x8xf32>
    tpu.vector_store %arg11[%c0_89, %c16_90], %224 {strides = array<i32>} : memref<16x32xf32, #tpu.memory_space<vmem>>, vector<16x8xf32>,
    %226 = vector.extract_strided_slice %174 {offsets = [0, 24], sizes = [16, 8], strides = [1, 1]} : vector<16x96xf32> to vector<16x8xf32>
    %227 = vector.extract_strided_slice %174 {offsets = [0, 56], sizes = [16, 8], strides = [1, 1]} : vector<16x96xf32> to vector<16x8xf32>
    %228 = vector.extract_strided_slice %174 {offsets = [0, 88], sizes = [16, 8], strides = [1, 1]} : vector<16x96xf32> to vector<16x8xf32>
    %cst_91 = arith.constant dense<0.000000e+00> : vector<16x16xf32>
    %229 = tpu.matmul %226, %227, %cst_91 {dimension_numbers = #tpu.dot_dimension_numbers<[1], [1], [0], [0], [0, 0, 1, 0], [], []>} : vector<16x8xf32>, vector<16x8xf32>, vector<16x16xf32> -> vector<16x16xf32>
    %230 = arith.addf %229, %6 : vector<16x16xf32>
    %cst_92 = arith.constant dense<0xFF800000> : vector<16xf32>
    %231 = vector.multi_reduction <maximumf>, %230, %cst_92 [1] : vector<16x16xf32> to vector<16xf32>
    %232 = vector.shape_cast %231 : vector<16xf32> to vector<16x1xf32>
    %233 = vector.broadcast %232 : vector<16x1xf32> to vector<16x16xf32>
    %234 = arith.subf %230, %233 : vector<16x16xf32>
    %235 = math.exp %234 : vector<16x16xf32>
    %cst_93 = arith.constant dense<0.000000e+00> : vector<16xf32>
    %236 = vector.multi_reduction <add>, %235, %cst_93 [1] : vector<16x16xf32> to vector<16xf32>
    %237 = vector.shape_cast %236 : vector<16xf32> to vector<16x1xf32>
    %238 = tpu.reciprocal %237 {approx = true} : vector<16x1xf32> -> vector<16x1xf32>
    %239 = vector.broadcast %238 : vector<16x1xf32> to vector<16x16xf32>
    %240 = arith.mulf %235, %239 : vector<16x16xf32>
    %cst_94 = arith.constant dense<0.000000e+00> : vector<16x8xf32>
    %241 = tpu.matmul %240, %228, %cst_94 {dimension_numbers = #tpu.dot_dimension_numbers<[1], [0], [0], [1], [0, 0, 1, 1], [], []>} : vector<16x16xf32>, vector<16x8xf32>, vector<16x8xf32> -> vector<16x8xf32>
    %c0_95 = arith.constant 0 : index
    %c24_96 = arith.constant 24 : index
    %242 = vector.load %arg11[%c0_95, %c24_96] : memref<16x32xf32, #tpu.memory_space<vmem>>, vector<16x8xf32>
    tpu.vector_store %arg11[%c0_95, %c24_96], %241 {strides = array<i32>} : memref<16x32xf32, #tpu.memory_space<vmem>>, vector<16x8xf32>,
    %c0_97 = arith.constant 0 : index
    %c0_98 = arith.constant 0 : index
    %243 = vector.load %arg11[%c0_97, %c0_98] : memref<16x32xf32, #tpu.memory_space<vmem>>, vector<16x32xf32>
    %cst_99 = arith.constant dense<0.000000e+00> : vector<16x32xf32>
    %244 = tpu.matmul %243, %157, %cst_99 {dimension_numbers = #tpu.dot_dimension_numbers<[1], [0], [0], [1], [0, 0, 1, 1], [], []>} : vector<16x32xf32>, vector<32x32xf32>, vector<16x32xf32> -> vector<16x32xf32>
    %245 = vector.broadcast %166 : vector<1x32xf32> to vector<16x32xf32>
    %246 = arith.addf %244, %245 : vector<16x32xf32>
    %247 = arith.addf %153, %246 : vector<16x32xf32>
    %cst_100 = arith.constant dense<0.000000e+00> : vector<16xf32>
    %248 = vector.multi_reduction <add>, %247, %cst_100 [1] : vector<16x32xf32> to vector<16xf32>
    %249 = vector.shape_cast %248 : vector<16xf32> to vector<16x1xf32>
    %cst_101 = arith.constant 3.200000e+01 : f32
    %250 = vector.broadcast %cst_101 : f32 to vector<16x1xf32>
    %251 = arith.divf %249, %250 : vector<16x1xf32>
    %252 = vector.broadcast %251 : vector<16x1xf32> to vector<16x32xf32>
    %253 = arith.subf %247, %252 : vector<16x32xf32>
    %254 = arith.mulf %253, %253 : vector<16x32xf32>
    %cst_102 = arith.constant dense<0.000000e+00> : vector<16xf32>
    %255 = vector.multi_reduction <add>, %254, %cst_102 [1] : vector<16x32xf32> to vector<16xf32>
    %256 = vector.shape_cast %255 : vector<16xf32> to vector<16x1xf32>
    %cst_103 = arith.constant 3.200000e+01 : f32
    %257 = vector.broadcast %cst_103 : f32 to vector<16x1xf32>
    %258 = arith.divf %256, %257 : vector<16x1xf32>
    %259 = vector.broadcast %251 : vector<16x1xf32> to vector<16x32xf32>
    %260 = arith.subf %247, %259 : vector<16x32xf32>
    %cst_104 = arith.constant 9.99999974E-6 : f32
    %261 = vector.broadcast %cst_104 : f32 to vector<16x1xf32>
    %262 = arith.addf %258, %261 : vector<16x1xf32>
    %263 = math.rsqrt %262 : vector<16x1xf32>
    %264 = vector.broadcast %263 : vector<16x1xf32> to vector<16x32xf32>
    %265 = arith.mulf %260, %264 : vector<16x32xf32>
    %266 = vector.broadcast %167 : vector<1x32xf32> to vector<16x32xf32>
    %267 = arith.mulf %265, %266 : vector<16x32xf32>
    %268 = vector.broadcast %168 : vector<1x32xf32> to vector<16x32xf32>
    %269 = arith.addf %267, %268 : vector<16x32xf32>
    %cst_105 = arith.constant dense<0.000000e+00> : vector<16x64xf32>
    %270 = tpu.matmul %269, %159, %cst_105 {dimension_numbers = #tpu.dot_dimension_numbers<[1], [0], [0], [1], [0, 0, 1, 1], [], []>} : vector<16x32xf32>, vector<32x64xf32>, vector<16x64xf32> -> vector<16x64xf32>
    %271 = vector.broadcast %165 : vector<1x64xf32> to vector<16x64xf32>
    %272 = arith.addf %270, %271 : vector<16x64xf32>
    %cst_106 = arith.constant 0.000000e+00 : f32
    %273 = vector.broadcast %cst_106 : f32 to vector<16x64xf32>
    %274 = arith.maximumf %272, %273 : vector<16x64xf32>
    %cst_107 = arith.constant dense<0.000000e+00> : vector<16x32xf32>
    %275 = tpu.matmul %274, %161, %cst_107 {dimension_numbers = #tpu.dot_dimension_numbers<[1], [0], [0], [1], [0, 0, 1, 1], [], []>} : vector<16x64xf32>, vector<64x32xf32>, vector<16x32xf32> -> vector<16x32xf32>
    %276 = vector.broadcast %171 : vector<1x32xf32> to vector<16x32xf32>
    %277 = arith.addf %275, %276 : vector<16x32xf32>
    %278 = arith.addf %269, %277 : vector<16x32xf32>
    %cst_108 = arith.constant dense<0.000000e+00> : vector<16xf32>
    %279 = vector.multi_reduction <add>, %278, %cst_108 [1] : vector<16x32xf32> to vector<16xf32>
    %280 = vector.shape_cast %279 : vector<16xf32> to vector<16x1xf32>
    %cst_109 = arith.constant 3.200000e+01 : f32
    %281 = vector.broadcast %cst_109 : f32 to vector<16x1xf32>
    %282 = arith.divf %280, %281 : vector<16x1xf32>
    %283 = vector.broadcast %282 : vector<16x1xf32> to vector<16x32xf32>
    %284 = arith.subf %278, %283 : vector<16x32xf32>
    %285 = arith.mulf %284, %284 : vector<16x32xf32>
    %cst_110 = arith.constant dense<0.000000e+00> : vector<16xf32>
    %286 = vector.multi_reduction <add>, %285, %cst_110 [1] : vector<16x32xf32> to vector<16xf32>
    %287 = vector.shape_cast %286 : vector<16xf32> to vector<16x1xf32>
    %cst_111 = arith.constant 3.200000e+01 : f32
    %288 = vector.broadcast %cst_111 : f32 to vector<16x1xf32>
    %289 = arith.divf %287, %288 : vector<16x1xf32>
    %290 = vector.broadcast %282 : vector<16x1xf32> to vector<16x32xf32>
    %291 = arith.subf %278, %290 : vector<16x32xf32>
    %cst_112 = arith.constant 9.99999974E-6 : f32
    %292 = vector.broadcast %cst_112 : f32 to vector<16x1xf32>
    %293 = arith.addf %289, %292 : vector<16x1xf32>
    %294 = math.rsqrt %293 : vector<16x1xf32>
    %295 = vector.broadcast %294 : vector<16x1xf32> to vector<16x32xf32>
    %296 = arith.mulf %291, %295 : vector<16x32xf32>
    %297 = vector.broadcast %169 : vector<1x32xf32> to vector<16x32xf32>
    %298 = arith.mulf %296, %297 : vector<16x32xf32>
    %299 = vector.broadcast %170 : vector<1x32xf32> to vector<16x32xf32>
    %300 = arith.addf %298, %299 : vector<16x32xf32>
    %c0_113 = arith.constant 0 : index
    %c0_114 = arith.constant 0 : index
    %301 = vector.load %arg8[%c0_113, %c0_114] : memref<32x16xf32, #tpu.memory_space<vmem>>, vector<32x16xf32>
    %cst_115 = arith.constant dense<0.000000e+00> : vector<16x16xf32>
    %302 = tpu.matmul %300, %301, %cst_115 {dimension_numbers = #tpu.dot_dimension_numbers<[1], [0], [0], [1], [0, 0, 1, 1], [], []>} : vector<16x32xf32>, vector<32x16xf32>, vector<16x16xf32> -> vector<16x16xf32>
    %c0_116 = arith.constant 0 : index
    %c0_117 = arith.constant 0 : index
    %303 = vector.load %arg9[%c0_116, %c0_117] : memref<1x16xf32, #tpu.memory_space<vmem>>, vector<1x16xf32>
    %304 = vector.broadcast %303 : vector<1x16xf32> to vector<16x16xf32>
    %305 = arith.addf %302, %304 : vector<16x16xf32>
    %c0_118 = arith.constant 0 : index
    %c0_119 = arith.constant 0 : index
    %306 = vector.load %arg10[%c0_118, %c0_119] : memref<16x16xf32, #tpu.memory_space<vmem>>, vector<16x16xf32>
    tpu.vector_store %arg10[%c0_118, %c0_119], %305 {strides = array<i32>} : memref<16x16xf32, #tpu.memory_space<vmem>>, vector<16x16xf32>,
    return
  }
}

</mosaic_0001>

<bundles_post_ra>
// kernel: decoder_forward.1
= control target key start
LH: loop header
LB: loop body
LE: loop exit
PB: predicated region body
PF: predicated region fallthrough
CT: control target
= control target key end

     0   :  { %vm68_vm0 = vcmask 261120   ;;  %s3880_s0 = inlined_call_operand.vmem [shape: f32[2,8,32], index: 0, kind: input, shape index: {}]   ;;  %s3881_s1 = inlined_call_operand.vmem [shape: f32[8,32], index: 1, kind: input, shape index: {}]   ;;  %s3882_s2 = inlined_call_operand.vmem [shape: f32[16,16], index: 2, kind: input, shape index: {}]   ;;  %s3883_s3 = inlined_call_operand.vmem [shape: f32[2,32,96], index: 3, kind: input, shape index: {}]   ;;  %s3884_s4 = inlined_call_operand.vmem [shape: f32[2,32,32], index: 4, kind: input, shape index: {}]   ;;  %s3885_s5 = inlined_call_operand.vmem [shape: f32[2,32,64], index: 5, kind: input, shape index: {}]   ;;  %s3886_s6 = inlined_call_operand.vmem [shape: f32[2,64,32], index: 6, kind: input, shape index: {}]   ;;  %s3887_s7 = inlined_call_operand.vmem [shape: f32[2,8,96], index: 7, kind: input, shape index: {}]   ;;  %s3888_s8 = inlined_call_operand.vmem [shape: f32[32,16], index: 8, kind: input, shape index: {}]   ;;  %s3889_s9 = inlined_call_operand.vmem [shape: f32[1,16], index: 9, kind: input, shape index: {}]   ;;  %s3890_s10 = inlined_call_operand.hbm [shape: f32[16,16], index: 10, kind: output, shape index: {}]  }
   0x1   :  { %v46_v0 = vld [vmem:[%s3883_s3 + $0x18] sm:$0xff]  ;;  %v45_v1 = vld [vmem:[%s3883_s3 + $0x10] sm:$0xff]  ;;  %v44_v2 = vld [vmem:[%s3883_s3 + $0x8] sm:$0xff] }
   0x2   :  { %2930 = vmatprep.subr.mxu0 %v46_v0  ;;  %v36_v3 = vld [vmem:[%s3880_s0] sm:$0xff]  ;;  %v37_v4 = vld [vmem:[%s3880_s0 + $0x8] sm:$0xff] }
   0x3   :  { %2931 = vmatpush3.msra.mxu0 %v46_v0  ;;  %v38_v5 = vld [vmem:[%s3881_s1] sm:$0xff] }
   0x4   :  { %15 = vsyncpa [#allocation4], 0  ;;  %2932 = vmatprep.subr.mxu0 %v45_v1  ;;  %v3366_v6 = vadd.f32 %v38_v5, %v36_v3  ;;  %v43_v7 = vld [vmem:[%s3883_s3] sm:$0xff]  ;;  %v3371_v8 = vadd.f32 %v38_v5, %v37_v4  ;;  %v64_v9 = vlaneseq  ;;  %vm156_vm1 = vcmask 64512   ;;  %s3277_s27 = smov 96   ;;  %v3412_v22 = vld [vmem:[%s3882_s2 + $0x8] sm:$0xff] }
   0x5   :  { %2933 = vmatpush3.msra.mxu0 %v45_v1  ;;  %v3383_v12 = vld [vmem:[%s3887_s7] sm:$0xff]  ;;  %vm240_vm2 = vcmask 130048   ;;  %s3278_s12 = smov 64   ;;  %s3279_s13 = smov 120   ;;  %vm560_vm3 = vcmask 130112   ;;  %vm771_vm4 = vcmask 195712  }
   0x6   :  { %2934 = vmatprep.subr.mxu0 %v44_v2  ;;  %2938 = vmatprep.mubr.msk.f32.mxu0 %vm68_vm0, %v3366_v6  ;;  %v3377_v10 = vshrl.u32 %v64_v9, 7  ;;  %v3407_v21 = vld [vmem:[%s3882_s2] sm:$0xff]  ;;  %s3280_s14 = smov 88   ;;  %s3281_s15 = smov 56   ;;  %vm982_vm5 = vcmask 261312   ;;  %vm1204_vm6 = vcmask 523264  }
   0x7   :  { %2935 = vmatpush3.msra.mxu0 %v44_v2  ;;  %s3282_s16 = smov 80   ;;  %s3283_s17 = smov 112  }
   0x8   :  { %2936 = vmatprep.subr.mxu0 %v43_v7  ;;  %v66_v11 = vsub.s32 0, %v3377_v10  ;;  %s3284_s18 = smov 48   ;;  %s3285_s19 = smov 72  }
   0x9   :  { %2937 = vmatpush3.msra.mxu0 %v43_v7  ;;  %s3286_s20 = smov 104   ;;  %s3287_s21 = smov 40  }
   0xa   :  { %2939 = vmatmul.mubr.msk.f32.vlgmr.msra.gmra.mxu0 %vm68_vm0, %v3371_v8  ;;  %v67_v13 = vrot.slane %v3383_v12, %v66_v11  ;;  %s3288_s22 = smov 8   ;;  %s3289_s23 = smov 16  }
   0xb   :  { %s3290_s11 = smov 24   ;;  %s3291_s0 = smov [#allocation3]  }
   0xc   :  { %s2705_s1 = sshll.u32 %s3291_s0, 4  ;;  %s2706_s1 = int_to_ptr.vmem [resolvable:$true] %s2705_s1 }
   0xd   :  { %s3255_s28 = scalar_lea.vmem %s2706_s1, 256  ;;  %p3260_p1 = scmp.lt.s32.totalorder %s2706_s1, %s2706_s1 }
   0xe   :  { %p3256_p0 = scmp.ne.s32.totalorder %s2706_s1, %s3255_s28  ;;  %p3261_p2 = scmp.lt.s32.totalorder %s3255_s28, %s3255_s28 }
  0x10   :  { %p3262_p3 = por %p3261_p2, %p3260_p1 }
  0x12   :  { %p3263_p4 = pnand %p3262_p3, %p3256_p0 }
  0xca   :  { %v2940_v14 = vpop.f32.mrf.mxu0 }
  0xcb   :  { %v3388_v15 = vadd.f32 %v2940_v14, %v67_v13 }
  0xcc   :  { %v141_v16 = vpop.f32.mrf.mxu0 }
  0xcd   :  { %v3390_v17 = vadd.f32 %v141_v16, %v67_v13  ;;  %154 = vrot.lane.b32.xlu0 %v3388_v15, %s3277_s27 }
  0xcf   :  { %2945 = vmatprep.mubr.msk.f32.mxu1 %vm156_vm1, %v3390_v17 }
  0xd1   :  { %152 = vrot.lane.b32.xlu0 %v3390_v17, %s3277_s27 }
 0x13f   :  { %v155_v18 = vpop.permute.xlu0 %154 }
 0x140   :  { %2941 = vmatprep.subr.msk.mxu1 %vm156_vm1, %v155_v18 }
 0x141   :  { %2942 = vmatpush3.xpose.msk.msra.mxu1 %vm156_vm1, %v155_v18 }
 0x143   :  { %v153_v19 = vpop.permute.xlu0 %152 }
 0x144   :  { %2943 = vmatprep.subr.msk.mxu1 %vm156_vm1, %v153_v19 }
 0x145   :  { %2944 = vmatpush3.xpose.msk.msra.mxu1 %vm156_vm1, %v153_v19 }
 0x148   :  { %2946 = vmatmul.mubr.msk.f32.vlgmr.msra.gmra.mxu1 %vm156_vm1, %v3388_v15 }
 0x208   :  { %v2947_v20 = vpop.f32.mrf.mxu1 }
 0x209   :  { %v237_v25 = vadd.f32 %v2947_v20, %v3412_v22 }
 0x20a   :  { %v231_v23 = vpop.f32.mrf.mxu1 }
 0x20b   :  { %v232_v24 = vadd.f32 %v231_v23, %v3407_v21  ;;  %v244_v27 = vsel %vm240_vm2, %v237_v25, -inf }
 0x20d   :  { %v241_v26 = vsel %vm240_vm2, %v232_v24, -inf }
 0x20e   :  { %242 = vmax.xlane.f32.xlu1 %v241_v26 }
 0x212   :  { %245 = vmax.xlane.f32.xlu1 %v244_v27 }
 0x297   :  { %v243_v28 = vpop.xlane.xlu1 %242 }
 0x298   :  { %v247_v29 = vsub.f32 %v232_v24, %v243_v28 }
 0x29a   :  { %v249_v30 = vmul.f32 1.442695, %v247_v29 }
 0x29b   :  { %v246_v31 = vpop.xlane.xlu1 %245 }
 0x29c   :  { %3173 = vpow2.f32 %v249_v30  ;;  %v248_v32 = vsub.f32 %v237_v25, %v246_v31 }
 0x29e   :  { %v251_v33 = vmul.f32 1.442695, %v248_v32 }
 0x2a0   :  { %3175 = vpow2.f32 %v251_v33 }
 0x2a9   :  { %v3174_v34 = vpop.eup %3173 }
 0x2aa   :  { %v253_v35 = vsel %vm240_vm2, %v3174_v34, 0.0 }
 0x2ab   :  { %254 = vadd.xlane.f32.xlu0 %v253_v35 }
 0x2ad   :  { %v3176_v36 = vpop.eup %3175 }
 0x2ae   :  { %v256_v37 = vsel %vm240_vm2, %v3176_v36, 0.0 }
 0x2af   :  { %257 = vadd.xlane.f32.xlu1 %v256_v37 }
 0x2c0   :  { %265 = vrot.lane.b32.xlu1 %v3388_v15, %s3278_s12 }
 0x2c1   :  { %352 = vrot.lane.b32.xlu0 %v3390_v17, %s3279_s13 }
 0x2c4   :  { %263 = vrot.lane.b32.xlu1 %v3390_v17, %s3278_s12 }
 0x2c8   :  { %358 = vrot.lane.b32.xlu1 %v3388_v15, %s3280_s14 }
 0x2cc   :  { %356 = vrot.lane.b32.xlu1 %v3390_v17, %s3280_s14 }
 0x2d0   :  { %354 = vrot.lane.b32.xlu1 %v3388_v15, %s3279_s13 }
 0x334   :  { %v255_v38 = vpop.xlane.xlu0 %254 }
 0x335   :  { %3177 = vrcp.f32 %v255_v38 }
 0x338   :  { %v258_v39 = vpop.xlane.xlu1 %257  ;;  %v353_v48 = vpop.permute.xlu0 %352 }
 0x339   :  { %3179 = vrcp.f32 %v258_v39 }
 0x33c   :  { %v266_v40 = vpop.permute.xlu1 %265 }
 0x33d   :  { %2948 = vmatprep.subr.mxu1 %v266_v40 }
 0x33e   :  { %2949 = vmatpush3.msra.mxu1 %v266_v40 }
 0x340   :  { %v264_v41 = vpop.permute.xlu1 %263 }
 0x341   :  { %2950 = vmatprep.subr.mxu1 %v264_v41 }
 0x342   :  { %v3178_v42 = vpop.eup %3177  ;;  %2951 = vmatpush3.msra.mxu1 %v264_v41 }
 0x343   :  { %v261_v43 = vmul.f32 %v3178_v42, %v3174_v34 }
 0x344   :  { %v359_v44 = vpop.permute.xlu1 %358 }
 0x345   :  { %2952 = vmatprep.mubr.msk.f32.mxu1 %vm240_vm2, %v261_v43  ;;  %2955 = vmatprep.subr.msk.mxu1 %vm156_vm1, %v359_v44 }
 0x346   :  { %v3180_v45 = vpop.eup %3179 }
 0x347   :  { %v262_v46 = vmul.f32 %v3180_v45, %v3176_v36 }
 0x348   :  { %v357_v47 = vpop.permute.xlu1 %356 }
 0x349   :  { %2953 = vmatmul.mubr.msk.f32.vlgmr.msra.gmra.mxu1 %vm240_vm2, %v262_v46 }
 0x34a   :  { %2956 = vmatpush3.xpose.msk.msra.mxu1 %vm156_vm1, %v359_v44  ;;  %2959 = vmatprep.mubr.msk.f32.mxu1 %vm156_vm1, %v353_v48 }
 0x34b   :  { %2957 = vmatprep.subr.msk.mxu1 %vm156_vm1, %v357_v47 }
 0x34c   :  { %v355_v49 = vpop.permute.xlu1 %354 }
 0x34e   :  { %2958 = vmatpush3.xpose.msk.msra.mxu1 %vm156_vm1, %v357_v47 }
 0x351   :  { %2960 = vmatmul.mubr.msk.f32.vlgmr.msra.gmra.mxu1 %vm156_vm1, %v355_v49 }
 0x409   :  { %v2954_v50 = vpop.f32.mrf.mxu1 }
 0x40a   :  { %351 = vst.msk [vmem:[#allocation2 + $0x8] sm:$0xff] %vm156_vm1, %v2954_v50 }
 0x40b   :  { %v341_v51 = vpop.f32.mrf.mxu1 }
 0x40c   :  { %350 = vst.msk [vmem:[#allocation2] sm:$0xff] %vm156_vm1, %v341_v51 }
 0x411   :  { %v2961_v52 = vpop.f32.mrf.mxu1 }
 0x412   :  { %v440_v53 = vadd.f32 %v2961_v52, %v3412_v22 }
 0x413   :  { %v434_v54 = vpop.f32.mrf.mxu1 }
 0x414   :  { %v435_v55 = vadd.f32 %v434_v54, %v3407_v21  ;;  %v446_v56 = vsel %vm240_vm2, %v440_v53, -inf }
 0x415   :  { %447 = vmax.xlane.f32.xlu0 %v446_v56 }
 0x416   :  { %v443_v57 = vsel %vm240_vm2, %v435_v55, -inf }
 0x417   :  { %444 = vmax.xlane.f32.xlu1 %v443_v57 }
 0x428   :  { %467 = vrot.lane.b32.xlu1 %v3388_v15, %s3281_s15 }
 0x42b   :  { %465 = vrot.lane.b32.xlu0 %v3390_v17, %s3281_s15 }
 0x42c   :  { %569 = vrot.lane.b32.xlu1 %v3388_v15, %s3282_s16 }
 0x42f   :  { %563 = vrot.lane.b32.xlu0 %v3390_v17, %s3283_s17 }
 0x430   :  { %567 = vrot.lane.b32.xlu1 %v3390_v17, %s3282_s16 }
 0x49e   :  { %v448_v58 = vpop.xlane.xlu0 %447 }
 0x49f   :  { %v450_v59 = vsub.f32 %v440_v53, %v448_v58 }
 0x4a0   :  { %v445_v60 = vpop.xlane.xlu1 %444 }
 0x4a1   :  { %v453_v61 = vmul.f32 1.442695, %v450_v59  ;;  %v449_v62 = vsub.f32 %v435_v55, %v445_v60 }
 0x4a2   :  { %v466_v1 = vpop.permute.xlu0 %465 }
 0x4a3   :  { %3181 = vpow2.f32 %v453_v61  ;;  %v451_v63 = vmul.f32 1.442695, %v449_v62 }
 0x4a4   :  { %v468_v0 = vpop.permute.xlu1 %467 }
 0x4a5   :  { %3183 = vpow2.f32 %v451_v63  ;;  %2962 = vmatprep.subr.mxu0 %v468_v0 }
 0x4a6   :  { %2963 = vmatpush3.msra.mxu0 %v468_v0  ;;  %v564_v23 = vpop.permute.xlu0 %563 }
 0x4a7   :  { %2964 = vmatprep.subr.mxu0 %v466_v1 }
 0x4a8   :  { %2965 = vmatpush3.msra.mxu0 %v466_v1  ;;  %v570_v2 = vpop.permute.xlu1 %569 }
 0x4a9   :  { %2969 = vmatprep.subr.msk.mxu0 %vm156_vm1, %v570_v2 }
 0x4ac   :  { %v568_v9 = vpop.permute.xlu1 %567 }
 0x4b0   :  { %v3182_v3 = vpop.eup %3181 }
 0x4b1   :  { %v458_v4 = vsel %vm240_vm2, %v3182_v3, 0.0 }
 0x4b2   :  { %v3184_v5 = vpop.eup %3183  ;;  %459 = vadd.xlane.f32.xlu1 %v458_v4 }
 0x4b3   :  { %v455_v7 = vsel %vm240_vm2, %v3184_v5, 0.0 }
 0x4b6   :  { %456 = vadd.xlane.f32.xlu1 %v455_v7 }
 0x4c7   :  { %565 = vrot.lane.b32.xlu1 %v3388_v15, %s3283_s17 }
 0x53b   :  { %v460_v13 = vpop.xlane.xlu1 %459 }
 0x53c   :  { %3185 = vrcp.f32 %v460_v13 }
 0x53f   :  { %v457_v14 = vpop.xlane.xlu1 %456 }
 0x540   :  { %3187 = vrcp.f32 %v457_v14 }
 0x543   :  { %v566_v24 = vpop.permute.xlu1 %565 }
 0x549   :  { %v3186_v16 = vpop.eup %3185 }
 0x54a   :  { %v464_v20 = vmul.f32 %v3186_v16, %v3182_v3 }
 0x54d   :  { %v3188_v18 = vpop.eup %3187 }
 0x54e   :  { %v463_v19 = vmul.f32 %v3188_v18, %v3184_v5 }
 0x550   :  { %2966 = vmatprep.mubr.msk.f32.mxu0 %vm240_vm2, %v463_v19 }
 0x551   :  { %2967 = vmatmul.mubr.msk.f32.vlgmr.msra.gmra.mxu0 %vm240_vm2, %v464_v20 }
 0x552   :  { %2970 = vmatpush3.xpose.msk.msra.mxu0 %vm156_vm1, %v570_v2  ;;  %2973 = vmatprep.mubr.msk.f32.mxu0 %vm156_vm1, %v564_v23 }
 0x553   :  { %2971 = vmatprep.subr.msk.mxu0 %vm156_vm1, %v568_v9 }
 0x556   :  { %2972 = vmatpush3.xpose.msk.msra.mxu0 %vm156_vm1, %v568_v9 }
 0x559   :  { %2974 = vmatmul.mubr.msk.f32.vlgmr.msra.gmra.mxu0 %vm156_vm1, %v566_v24 }
 0x611   :  { %v3468_v25 = vpop.f32.mrf.mxu0 }
 0x613   :  { %v3470_v26 = vpop.f32.mrf.mxu0 }
 0x619   :  { %v2975_v27 = vpop.f32.mrf.mxu0 }
 0x61a   :  { %v651_v28 = vadd.f32 %v2975_v27, %v3412_v22 }
 0x61b   :  { %v645_v29 = vpop.f32.mrf.mxu0 }
 0x61c   :  { %v646_v30 = vadd.f32 %v645_v29, %v3407_v21  ;;  %v657_v31 = vsel %vm240_vm2, %v651_v28, -inf  ;;  %v49_v29 = vld [vmem:[%s3884_s4 + $0x10] sm:$0xff] }
 0x61d   :  { %658 = vmax.xlane.f32.xlu1 %v657_v31  ;;  %v47_v31 = vld [vmem:[%s3884_s4] sm:$0xff] }
 0x61e   :  { %v654_v32 = vsel %vm240_vm2, %v646_v30, -inf }
 0x61f   :  { %655 = vmax.xlane.f32.xlu0 %v654_v32 }
 0x62e   :  { %678 = vrot.lane.b32.xlu1 %v3388_v15, %s3284_s18 }
 0x632   :  { %780 = vrot.lane.b32.xlu1 %v3388_v15, %s3285_s19 }
 0x636   :  { %778 = vrot.lane.b32.xlu1 %v3390_v17, %s3285_s19 }
 0x63a   :  { %776 = vrot.lane.b32.xlu1 %v3388_v15, %s3286_s20 }
 0x6a6   :  { %v659_v33 = vpop.xlane.xlu1 %658 }
 0x6a7   :  { %v661_v34 = vsub.f32 %v651_v28, %v659_v33 }
 0x6a8   :  { %v656_v35 = vpop.xlane.xlu0 %655 }
 0x6a9   :  { %v664_v36 = vmul.f32 1.442695, %v661_v34  ;;  %v660_v37 = vsub.f32 %v646_v30, %v656_v35  ;;  %v48_v30 = vld [vmem:[%s3884_s4 + $0x8] sm:$0xff] }
 0x6aa   :  { %v679_v38 = vpop.permute.xlu1 %678 }
 0x6ab   :  { %3189 = vpow2.f32 %v664_v36  ;;  %v662_v39 = vmul.f32 1.442695, %v660_v37  ;;  %2976 = vmatprep.subr.mxu1 %v679_v38 }
 0x6ac   :  { %2977 = vmatpush3.msra.mxu1 %v679_v38  ;;  %v989_v38 = vsub.s32 2, %v3377_v10 }
 0x6ad   :  { %3191 = vpow2.f32 %v662_v39 }
 0x6ae   :  { %v781_v47 = vpop.permute.xlu1 %780  ;;  %v990_v39 = vrot.slane %v3383_v12, %v989_v38 }
 0x6b2   :  { %v779_v53 = vpop.permute.xlu1 %778 }
 0x6b6   :  { %v777_v54 = vpop.permute.xlu1 %776 }
 0x6b8   :  { %v3190_v40 = vpop.eup %3189 }
 0x6b9   :  { %v669_v41 = vsel %vm240_vm2, %v3190_v40, 0.0 }
 0x6ba   :  { %v3192_v42 = vpop.eup %3191  ;;  %670 = vadd.xlane.f32.xlu0 %v669_v41 }
 0x6bb   :  { %v666_v43 = vsel %vm240_vm2, %v3192_v42, 0.0 }
 0x6be   :  { %667 = vadd.xlane.f32.xlu0 %v666_v43 }
 0x6d4   :  { %676 = vrot.lane.b32.xlu0 %v3390_v17, %s3284_s18 }
 0x6d8   :  { %774 = vrot.lane.b32.xlu0 %v3390_v17, %s3286_s20 }
 0x743   :  { %v671_v44 = vpop.xlane.xlu0 %670 }
 0x744   :  { %3193 = vrcp.f32 %v671_v44 }
 0x747   :  { %v668_v45 = vpop.xlane.xlu0 %667 }
 0x748   :  { %3195 = vrcp.f32 %v668_v45 }
 0x74b   :  { %v677_v46 = vpop.permute.xlu0 %676 }
 0x74c   :  { %2978 = vmatprep.subr.mxu1 %v677_v46 }
 0x74d   :  { %2979 = vmatpush3.msra.mxu1 %v677_v46 }
 0x74e   :  { %2983 = vmatprep.subr.msk.mxu1 %vm156_vm1, %v781_v47 }
 0x74f   :  { %v775_v52 = vpop.permute.xlu0 %774 }
 0x751   :  { %v3194_v48 = vpop.eup %3193 }
 0x752   :  { %v675_v51 = vmul.f32 %v3194_v48, %v3190_v40 }
 0x755   :  { %v3196_v49 = vpop.eup %3195 }
 0x756   :  { %v674_v50 = vmul.f32 %v3196_v49, %v3192_v42 }
 0x758   :  { %2980 = vmatprep.mubr.msk.f32.mxu1 %vm240_vm2, %v674_v50 }
 0x759   :  { %2981 = vmatmul.mubr.msk.f32.vlgmr.msra.gmra.mxu1 %vm240_vm2, %v675_v51 }
 0x75a   :  { %2984 = vmatpush3.xpose.msk.msra.mxu1 %vm156_vm1, %v781_v47  ;;  %2987 = vmatprep.mubr.msk.f32.mxu1 %vm156_vm1, %v775_v52 }
 0x75b   :  { %2985 = vmatprep.subr.msk.mxu1 %vm156_vm1, %v779_v53 }
 0x75e   :  { %2986 = vmatpush3.xpose.msk.msra.mxu1 %vm156_vm1, %v779_v53 }
 0x761   :  { %2988 = vmatmul.mubr.msk.f32.vlgmr.msra.gmra.mxu1 %vm156_vm1, %v777_v54 }
 0x819   :  { %v2982_v55 = vpop.f32.mrf.mxu1 }
 0x81b   :  { %v754_v56 = vpop.f32.mrf.mxu1 }
 0x821   :  { %v2989_v57 = vpop.f32.mrf.mxu1 }
 0x822   :  { %v862_v58 = vadd.f32 %v2989_v57, %v3412_v22  ;;  %v53_v57 = vld [vmem:[%s3885_s5 + $0x10] sm:$0xff] }
 0x823   :  { %v856_v59 = vpop.f32.mrf.mxu1 }
 0x824   :  { %v857_v60 = vadd.f32 %v856_v59, %v3407_v21  ;;  %v868_v61 = vsel %vm240_vm2, %v862_v58, -inf  ;;  %v51_v59 = vld [vmem:[%s3885_s5] sm:$0xff] }
 0x825   :  { %869 = vmax.xlane.f32.xlu1 %v868_v61  ;;  %v61_v61 = vld [vmem:[%s3886_s6 + $0x30] sm:$0xff] }
 0x826   :  { %v865_v62 = vsel %vm240_vm2, %v857_v60, -inf }
 0x827   :  { %866 = vmax.xlane.f32.xlu0 %v865_v62  ;;  %v60_v62 = vld [vmem:[%s3886_s6 + $0x28] sm:$0xff] }
 0x836   :  { %889 = vrot.lane.b32.xlu1 %v3388_v15, %s3287_s21 }
 0x83a   :  { %554 = vrot.lane.b32.xlu1 %v3470_v26, %s3288_s22 }
 0x83e   :  { %556 = vrot.lane.b32.xlu1 %v3468_v25, %s3288_s22 }
 0x842   :  { %767 = vrot.lane.b32.xlu1 %v2982_v55, %s3289_s23 }
 0x8ae   :  { %v870_v63 = vpop.xlane.xlu1 %869 }
 0x8af   :  { %v872_v0 = vsub.f32 %v862_v58, %v870_v63  ;;  %v52_v58 = vld [vmem:[%s3885_s5 + $0x8] sm:$0xff]  ;;  %v59_v63 = vld [vmem:[%s3886_s6 + $0x20] sm:$0xff] }
 0x8b0   :  { %v867_v1 = vpop.xlane.xlu0 %866 }
 0x8b1   :  { %v875_v2 = vmul.f32 1.442695, %v872_v0  ;;  %v871_v3 = vsub.f32 %v857_v60, %v867_v1  ;;  %v62_v60 = vld [vmem:[%s3886_s6 + $0x38] sm:$0xff] }
 0x8b2   :  { %v890_v4 = vpop.permute.xlu1 %889 }
 0x8b3   :  { %3197 = vpow2.f32 %v875_v2  ;;  %v873_v5 = vmul.f32 1.442695, %v871_v3  ;;  %2990 = vmatprep.subr.mxu0 %v890_v4 }
 0x8b4   :  { %2991 = vmatpush3.msra.mxu0 %v890_v4 }
 0x8b5   :  { %3199 = vpow2.f32 %v873_v5 }
 0x8b6   :  { %v555_v15 = vpop.permute.xlu1 %554 }
 0x8b7   :  { %561 = vst.msk [vmem:[#allocation2] sm:$0xff] %vm560_vm3, %v555_v15  ;;  %v1103_v15 = vsub.s32 3, %v3377_v10 }
 0x8ba   :  { %v557_v7 = vpop.permute.xlu1 %556 }
 0x8bb   :  { %562 = vst.msk [vmem:[#allocation2 + $0x8] sm:$0xff] %vm560_vm3, %v557_v7  ;;  %v1109_v7 = vsub.s32 4, %v3377_v10 }
 0x8be   :  { %v768_v9 = vpop.permute.xlu1 %767 }
 0x8bf   :  { %773 = vst.msk [vmem:[#allocation2 + $0x8] sm:$0xff] %vm771_vm4, %v768_v9  ;;  %v1104_v9 = vrot.slane %v3383_v12, %v1103_v15 }
 0x8c0   :  { %v3198_v13 = vpop.eup %3197 }
 0x8c1   :  { %v880_v14 = vsel %vm240_vm2, %v3198_v13, 0.0 }
 0x8c2   :  { %v3200_v16 = vpop.eup %3199  ;;  %881 = vadd.xlane.f32.xlu0 %v880_v14 }
 0x8c3   :  { %v877_v18 = vsel %vm240_vm2, %v3200_v16, 0.0 }
 0x8c6   :  { %878 = vadd.xlane.f32.xlu0 %v877_v18 }
 0x8dc   :  { %887 = vrot.lane.b32.xlu0 %v3390_v17, %s3287_s21  ;;  %v50_v17 = vld [vmem:[%s3884_s4 + $0x18] sm:$0xff] }
 0x8e0   :  { %765 = vrot.lane.b32.xlu0 %v754_v56, %s3289_s23 }
 0x94b   :  { %v882_v19 = vpop.xlane.xlu0 %881 }
 0x94c   :  { %3201 = vrcp.f32 %v882_v19 }
 0x94f   :  { %v879_v20 = vpop.xlane.xlu0 %878 }
 0x950   :  { %3203 = vrcp.f32 %v879_v20 }
 0x953   :  { %v888_v23 = vpop.permute.xlu0 %887 }
 0x954   :  { %2992 = vmatprep.subr.mxu0 %v888_v23 }
 0x955   :  { %2993 = vmatpush3.msra.mxu0 %v888_v23 }
 0x956   :  { %2997 = vmatprep.subr.mxu0 %v50_v17 }
 0x957   :  { %v766_v24 = vpop.permute.xlu0 %765 }
 0x958   :  { %772 = vst.msk [vmem:[#allocation2] sm:$0xff] %vm771_vm4, %v766_v24 }
 0x959   :  { %v3202_v25 = vpop.eup %3201 }
 0x95a   :  { %v886_v28 = vmul.f32 %v3202_v25, %v3198_v13 }
 0x95d   :  { %v3204_v26 = vpop.eup %3203 }
 0x95e   :  { %v885_v27 = vmul.f32 %v3204_v26, %v3200_v16  ;;  %v1110_v16 = vrot.slane %v3383_v12, %v1109_v7  ;;  %v58_v26 = vld [vmem:[%s3886_s6 + $0x18] sm:$0xff] }
 0x960   :  { %2994 = vmatprep.mubr.msk.f32.mxu0 %vm240_vm2, %v885_v27  ;;  %v57_v27 = vld [vmem:[%s3886_s6 + $0x10] sm:$0xff] }
 0x961   :  { %2995 = vmatmul.mubr.msk.f32.vlgmr.msra.gmra.mxu0 %vm240_vm2, %v886_v28  ;;  %v56_v28 = vld [vmem:[%s3886_s6 + $0x8] sm:$0xff] }
 0x962   :  { %2998 = vmatpush3.msra.mxu0 %v50_v17  ;;  %v55_v17 = vld [vmem:[%s3886_s6] sm:$0xff] }
 0x963   :  { %2999 = vmatprep.subr.mxu0 %v49_v29 }
 0x964   :  { %3000 = vmatpush3.msra.mxu0 %v49_v29  ;;  %v1115_v29 = vsub.s32 1, %v3377_v10 }
 0x965   :  { %3001 = vmatprep.subr.mxu0 %v48_v30 }
 0x966   :  { %3002 = vmatpush3.msra.mxu0 %v48_v30  ;;  %v1116_v30 = vrot.slane %v3383_v12, %v1115_v29 }
 0x967   :  { %3003 = vmatprep.subr.mxu0 %v47_v31 }
 0x968   :  { %3004 = vmatpush3.msra.mxu0 %v47_v31 }
 0x969   :  { %3019 = vmatprep.subr.mxu0 %v62_v60 }
 0xa21   :  { %v2996_v32 = vpop.f32.mrf.mxu0 }
 0xa22   :  { %978 = vrot.lane.b32.xlu1 %v2996_v32, %s3290_s11 }
 0xa23   :  { %v965_v33 = vpop.f32.mrf.mxu0 }
 0xa24   :  { %976 = vrot.lane.b32.xlu0 %v965_v33, %s3290_s11 }
 0xa94   :  { %v979_v34 = vpop.permute.xlu1 %978 }
 0xa95   :  { %984 = vst.msk [vmem:[#allocation2 + $0x8] sm:$0xff] %vm982_vm5, %v979_v34 }
 0xa96   :  { %v977_v35 = vpop.permute.xlu0 %976 }
 0xa97   :  { %983 = vst.msk [vmem:[#allocation2] sm:$0xff] %vm982_vm5, %v977_v35 }
 0xa9c   :  { %v986_v37 = vld [vmem:[#allocation2 + $0x8] sm:$0xff] }
 0xa9e   :  { %v985_v36 = vld [vmem:[#allocation2] sm:$0xff] }
 0xa9f   :  { %3005 = vmatprep.mubr.msk.f32.mxu0 %vm68_vm0, %v985_v36 }
 0xaa0   :  { %3006 = vmatmul.mubr.msk.f32.vlgmr.msra.gmra.mxu0 %vm68_vm0, %v986_v37  ;;  %v1202_v37 = vsub.s32 7, %v3377_v10 }
 0xaa1   :  { %3020 = vmatpush3.msra.mxu0 %v62_v60 }
 0xaa2   :  { %3021 = vmatprep.subr.mxu0 %v61_v61 }
 0xaa3   :  { %3022 = vmatpush3.msra.mxu0 %v61_v61 }
 0xaa4   :  { %3023 = vmatprep.subr.mxu0 %v60_v62 }
 0xaa5   :  { %3024 = vmatpush3.msra.mxu0 %v60_v62 }
 0xaa6   :  { %3025 = vmatprep.subr.mxu0 %v59_v63 }
 0xaa7   :  { %3026 = vmatpush3.msra.mxu0 %v59_v63 }
 0xaa8   :  { %3027 = vmatprep.subr.mxu0 %v58_v26 }
 0xaa9   :  { %3028 = vmatpush3.msra.mxu0 %v58_v26 }
 0xaaa   :  { %3029 = vmatprep.subr.mxu0 %v57_v27 }
 0xaab   :  { %3030 = vmatpush3.msra.mxu0 %v57_v27 }
 0xaac   :  { %3031 = vmatprep.subr.mxu0 %v56_v28 }
 0xaad   :  { %3032 = vmatpush3.msra.mxu0 %v56_v28 }
 0xaae   :  { %3033 = vmatprep.subr.mxu0 %v55_v17 }
 0xaaf   :  { %3034 = vmatpush3.msra.mxu0 %v55_v17 }
 0xb60   :  { %v3007_v40 = vpop.f32.mrf.mxu0 }
 0xb61   :  { %v1069_v41 = vadd.f32 %v3007_v40, %v990_v39 }
 0xb62   :  { %v1063_v42 = vpop.f32.mrf.mxu0 }
 0xb63   :  { %v1064_v43 = vadd.f32 %v1063_v42, %v990_v39  ;;  %v1073_v44 = vadd.f32 %v1069_v41, %v3371_v8  ;;  %v1203_v39 = vrot.slane %v3383_v12, %v1202_v37 }
 0xb65   :  { %v1077_v45 = vsel %vm68_vm0, %v1073_v44, 0.0  ;;  %v1072_v46 = vadd.f32 %v1064_v43, %v3366_v6  ;;  %v54_v6 = vld [vmem:[%s3885_s5 + $0x18] sm:$0xff] }
 0xb66   :  { %1078 = vadd.xlane.f32.xlu1 %v1077_v45  ;;  %3008 = vmatprep.subr.mxu1 %v54_v6 }
 0xb67   :  { %v1074_v47 = vsel %vm68_vm0, %v1072_v46, 0.0  ;;  %3009 = vmatpush3.msra.mxu1 %v54_v6  ;;  %v2751_v6 = vld [vmem:[%s3883_s3 + $0x38] sm:$0xff] }
 0xb68   :  { %1075 = vadd.xlane.f32.xlu0 %v1074_v47  ;;  %3010 = vmatprep.subr.mxu1 %v53_v57 }
 0xb69   :  { %3011 = vmatpush3.msra.mxu1 %v53_v57  ;;  %v2750_v57 = vld [vmem:[%s3883_s3 + $0x30] sm:$0xff] }
 0xb6a   :  { %3012 = vmatprep.subr.mxu1 %v52_v58 }
 0xb6b   :  { %3013 = vmatpush3.msra.mxu1 %v52_v58  ;;  %v2749_v58 = vld [vmem:[%s3883_s3 + $0x28] sm:$0xff] }
 0xb6c   :  { %3014 = vmatprep.subr.mxu1 %v51_v59 }
 0xb6d   :  { %3015 = vmatpush3.msra.mxu1 %v51_v59  ;;  %v2748_v59 = vld [vmem:[%s3883_s3 + $0x20] sm:$0xff] }
 0xb6e   :  { %3038 = vmatprep.subr.mxu1 %v2751_v6 }
 0xbef   :  { %v1079_v48 = vpop.xlane.xlu1 %1078 }
 0xbf0   :  { %v1082_v49 = vmul.f32 0.03125, %v1079_v48 }
 0xbf1   :  { %v1076_v50 = vpop.xlane.xlu0 %1075 }
 0xbf2   :  { %v1081_v51 = vmul.f32 0.03125, %v1076_v50  ;;  %v1084_v52 = vsub.f32 %v1073_v44, %v1082_v49 }
 0xbf4   :  { %v1083_v53 = vsub.f32 %v1072_v46, %v1081_v51  ;;  %v1086_v56 = vmul.f32 %v1084_v52, %v1084_v52 }
 0xbf6   :  { %v1085_v54 = vmul.f32 %v1083_v53, %v1083_v53  ;;  %v1090_v8 = vsel %vm68_vm0, %v1086_v56, 0.0 }
 0xbf8   :  { %v1087_v55 = vsel %vm68_vm0, %v1085_v54, 0.0 }
 0xbf9   :  { %1088 = vadd.xlane.f32.xlu0 %v1087_v55 }
 0xbfd   :  { %1091 = vadd.xlane.f32.xlu0 %v1090_v8 }
 0xc82   :  { %v1089_v0 = vpop.xlane.xlu0 %1088 }
 0xc83   :  { %v1093_v1 = vmul.f32 0.03125, %v1089_v0 }
 0xc85   :  { %v1095_v2 = vadd.f32 1e-05, %v1093_v1 }
 0xc86   :  { %v1092_v3 = vpop.xlane.xlu0 %1091 }
 0xc87   :  { %3205 = vrsqrt.f32 %v1095_v2  ;;  %v1094_v4 = vmul.f32 0.03125, %v1092_v3  ;;  %v1316_v2 = vsub.s32 5, %v3377_v10 }
 0xc89   :  { %v1096_v5 = vadd.f32 1e-05, %v1094_v4  ;;  %v1317_v4 = vrot.slane %v3383_v12, %v1316_v2 }
 0xc8b   :  { %3207 = vrsqrt.f32 %v1096_v5  ;;  %v1322_v5 = vsub.s32 6, %v3377_v10 }
 0xc94   :  { %v3206_v13 = vpop.eup %3205 }
 0xc95   :  { %v1099_v14 = vmul.f32 %v3206_v13, %v1083_v53 }
 0xc97   :  { %v1105_v18 = vmul.f32 %v1104_v9, %v1099_v14 }
 0xc98   :  { %v3208_v19 = vpop.eup %3207 }
 0xc99   :  { %v1100_v20 = vmul.f32 %v3208_v19, %v1084_v52  ;;  %v1111_v23 = vadd.f32 %v1110_v16, %v1105_v18  ;;  %v1323_v18 = vrot.slane %v3383_v12, %v1322_v5 }
 0xc9b   :  { %v1106_v24 = vmul.f32 %v1104_v9, %v1100_v20  ;;  %3016 = vmatprep.mubr.msk.f32.mxu1 %vm68_vm0, %v1111_v23 }
 0xc9d   :  { %v1112_v25 = vadd.f32 %v1110_v16, %v1106_v24  ;;  %v3639_v24 = vld [vmem:[%s3887_s7 + $0x8] sm:$0xff] }
 0xc9e   :  { %v1355_v12 = vrot.slane %v3639_v24, %v66_v11 }
 0xc9f   :  { %3017 = vmatmul.mubr.msk.f32.vlgmr.msra.gmra.mxu1 %vm68_vm0, %v1112_v25 }
 0xca0   :  { %3039 = vmatpush3.msra.mxu1 %v2751_v6 }
 0xca1   :  { %3040 = vmatprep.subr.mxu1 %v2750_v57 }
 0xca2   :  { %3041 = vmatpush3.msra.mxu1 %v2750_v57 }
 0xca3   :  { %3042 = vmatprep.subr.mxu1 %v2749_v58 }
 0xca4   :  { %3043 = vmatpush3.msra.mxu1 %v2749_v58 }
 0xca5   :  { %3044 = vmatprep.subr.mxu1 %v2748_v59 }
 0xca6   :  { %3045 = vmatpush3.msra.mxu1 %v2748_v59 }
 0xd5f   :  { %v3018_v31 = vpop.f32.mrf.mxu1 }
 0xd60   :  { %v1195_v32 = vadd.f32 %v3018_v31, %v1116_v30 }
 0xd61   :  { %v1189_v33 = vpop.f32.mrf.mxu1 }
 0xd62   :  { %v1190_v34 = vadd.f32 %v1189_v33, %v1116_v30  ;;  %v1199_v36 = vmax.f32 %v1195_v32, 0.0 }
 0xd64   :  { %v1198_v35 = vmax.f32 %v1190_v34, 0.0 }
 0xd66   :  { %3035 = vmatprep.mubr.msk.f32.mxu0 %vm1204_vm6, %v1198_v35 }
 0xd67   :  { %3036 = vmatmul.mubr.msk.f32.vlgmr.msra.gmra.mxu0 %vm1204_vm6, %v1199_v36 }
 0xe27   :  { %v3037_v40 = vpop.f32.mrf.mxu0 }
 0xe28   :  { %v1283_v41 = vadd.f32 %v3037_v40, %v1203_v39 }
 0xe29   :  { %v1277_v42 = vpop.f32.mrf.mxu0 }
 0xe2a   :  { %v1278_v43 = vadd.f32 %v1277_v42, %v1203_v39  ;;  %v1287_v44 = vadd.f32 %v1283_v41, %v1112_v25 }
 0xe2c   :  { %v1291_v45 = vsel %vm68_vm0, %v1287_v44, 0.0  ;;  %v1286_v46 = vadd.f32 %v1278_v43, %v1111_v23 }
 0xe2d   :  { %1292 = vadd.xlane.f32.xlu0 %v1291_v45 }
 0xe2e   :  { %v1288_v47 = vsel %vm68_vm0, %v1286_v46, 0.0 }
 0xe2f   :  { %1289 = vadd.xlane.f32.xlu1 %v1288_v47 }
 0xeb6   :  { %v1293_v48 = vpop.xlane.xlu0 %1292 }
 0xeb7   :  { %v1295_v49 = vmul.f32 0.03125, %v1293_v48 }
 0xeb8   :  { %v1290_v50 = vpop.xlane.xlu1 %1289 }
 0xeb9   :  { %v1297_v51 = vsub.f32 %v1287_v44, %v1295_v49  ;;  %v1294_v52 = vmul.f32 0.03125, %v1290_v50 }
 0xebb   :  { %v1296_v53 = vsub.f32 %v1286_v46, %v1294_v52  ;;  %v1299_v54 = vmul.f32 %v1297_v51, %v1297_v51 }
 0xebd   :  { %v1303_v55 = vsel %vm68_vm0, %v1299_v54, 0.0  ;;  %v1298_v56 = vmul.f32 %v1296_v53, %v1296_v53 }
 0xebe   :  { %1304 = vadd.xlane.f32.xlu0 %v1303_v55 }
 0xebf   :  { %v1300_v8 = vsel %vm68_vm0, %v1298_v56, 0.0 }
 0xec0   :  { %1301 = vadd.xlane.f32.xlu1 %v1300_v8 }
 0xf47   :  { %v1305_v60 = vpop.xlane.xlu0 %1304 }
 0xf48   :  { %v1307_v61 = vmul.f32 0.03125, %v1305_v60 }
 0xf49   :  { %v1302_v62 = vpop.xlane.xlu1 %1301 }
 0xf4a   :  { %v1309_v63 = vadd.f32 1e-05, %v1307_v61  ;;  %v1306_v0 = vmul.f32 0.03125, %v1302_v62 }
 0xf4c   :  { %3209 = vrsqrt.f32 %v1309_v63  ;;  %v1308_v1 = vadd.f32 1e-05, %v1306_v0 }
 0xf4e   :  { %3211 = vrsqrt.f32 %v1308_v1 }
 0xf59   :  { %v3210_v3 = vpop.eup %3209 }
 0xf5a   :  { %v1313_v9 = vmul.f32 %v3210_v3, %v1297_v51 }
 0xf5b   :  { %v3212_v13 = vpop.eup %3211 }
 0xf5c   :  { %v1312_v14 = vmul.f32 %v3212_v13, %v1296_v53  ;;  %v1319_v16 = vmul.f32 %v1317_v4, %v1313_v9 }
 0xf5e   :  { %v1318_v19 = vmul.f32 %v1317_v4, %v1312_v14  ;;  %v3630_v23 = vadd.f32 %v1323_v18, %v1319_v16 }
 0xf60   :  { %v3628_v20 = vadd.f32 %v1323_v18, %v1318_v19 }
 0xf62   :  { %3046 = vmatprep.mubr.msk.f32.mxu1 %vm68_vm0, %v3628_v20 }
 0xf63   :  { %3047 = vmatmul.mubr.msk.f32.vlgmr.msra.gmra.mxu1 %vm68_vm0, %v3630_v23 }
0x1023   :  { %v3048_v25 = vpop.f32.mrf.mxu1 }
0x1024   :  { %v3644_v26 = vadd.f32 %v3048_v25, %v1355_v12 }
0x1025   :  { %v1428_v27 = vpop.f32.mrf.mxu1 }
0x1026   :  { %v3646_v28 = vadd.f32 %v1428_v27, %v1355_v12  ;;  %1441 = vrot.lane.b32.xlu1 %v3644_v26, %s3277_s27 }
0x1028   :  { %1439 = vrot.lane.b32.xlu0 %v3646_v28, %s3277_s27  ;;  %3053 = vmatprep.mubr.msk.f32.mxu1 %vm156_vm1, %v3646_v28 }
0x102a   :  { %1643 = vrot.lane.b32.xlu1 %v3644_v26, %s3280_s14 }
0x102c   :  { %1637 = vrot.lane.b32.xlu0 %v3646_v28, %s3279_s13 }
0x102e   :  { %1641 = vrot.lane.b32.xlu1 %v3646_v28, %s3280_s14 }
0x1032   :  { %1639 = vrot.lane.b32.xlu1 %v3644_v26, %s3279_s13 }
0x1098   :  { %v1442_v11 = vpop.permute.xlu1 %1441 }
0x1099   :  { %3049 = vmatprep.subr.msk.mxu1 %vm156_vm1, %v1442_v11 }
0x109a   :  { %3050 = vmatpush3.xpose.msk.msra.mxu1 %vm156_vm1, %v1442_v11  ;;  %v1440_v17 = vpop.permute.xlu0 %1439 }
0x109b   :  { %3051 = vmatprep.subr.msk.mxu1 %vm156_vm1, %v1440_v17 }
0x109c   :  { %v1644_v30 = vpop.permute.xlu1 %1643 }
0x109e   :  { %3052 = vmatpush3.xpose.msk.msra.mxu1 %vm156_vm1, %v1440_v17  ;;  %v1638_v31 = vpop.permute.xlu0 %1637 }
0x109f   :  { %3063 = vmatprep.subr.msk.mxu1 %vm156_vm1, %v1644_v30 }
0x10a0   :  { %v1642_v32 = vpop.permute.xlu1 %1641 }
0x10a1   :  { %3054 = vmatmul.mubr.msk.f32.vlgmr.msra.gmra.mxu1 %vm156_vm1, %v3644_v26 }
0x10a2   :  { %3064 = vmatpush3.xpose.msk.msra.mxu1 %vm156_vm1, %v1644_v30  ;;  %3067 = vmatprep.mubr.msk.f32.mxu1 %vm156_vm1, %v1638_v31 }
0x10a3   :  { %3065 = vmatprep.subr.msk.mxu1 %vm156_vm1, %v1642_v32 }
0x10a4   :  { %v1640_v33 = vpop.permute.xlu1 %1639 }
0x10a6   :  { %3066 = vmatpush3.xpose.msk.msra.mxu1 %vm156_vm1, %v1642_v32 }
0x10a9   :  { %3068 = vmatmul.mubr.msk.f32.vlgmr.msra.gmra.mxu1 %vm156_vm1, %v1640_v33 }
0x1161   :  { %v3055_v34 = vpop.f32.mrf.mxu1 }
0x1162   :  { %v1523_v35 = vadd.f32 %v3055_v34, %v3412_v22 }
0x1163   :  { %v1517_v36 = vpop.f32.mrf.mxu1 }
0x1164   :  { %v1518_v39 = vadd.f32 %v1517_v36, %v3407_v21  ;;  %v1529_v40 = vsel %vm240_vm2, %v1523_v35, -inf }
0x1165   :  { %1530 = vmax.xlane.f32.xlu1 %v1529_v40 }
0x1166   :  { %v1526_v41 = vsel %vm240_vm2, %v1518_v39, -inf }
0x1167   :  { %1527 = vmax.xlane.f32.xlu0 %v1526_v41 }
0x1169   :  { %v3069_v42 = vpop.f32.mrf.mxu1 }
0x116a   :  { %v1725_v45 = vadd.f32 %v3069_v42, %v3412_v22  ;;  %v3253_v42 = vld [vmem:[%s3882_s2 + $0x8] sm:$0xff] }
0x116b   :  { %v1719_v43 = vpop.f32.mrf.mxu1 }
0x116c   :  { %v1720_v44 = vadd.f32 %v1719_v43, %v3407_v21  ;;  %v1731_v47 = vsel %vm240_vm2, %v1725_v45, -inf }
0x116e   :  { %v1728_v46 = vsel %vm240_vm2, %v1720_v44, -inf }
0x116f   :  { %1729 = vmax.xlane.f32.xlu0 %v1728_v46 }
0x1173   :  { %1732 = vmax.xlane.f32.xlu0 %v1731_v47 }
0x1176   :  { %1550 = vrot.lane.b32.xlu1 %v3644_v26, %s3278_s12 }
0x117a   :  { %1752 = vrot.lane.b32.xlu1 %v3644_v26, %s3281_s15 }
0x117e   :  { %1750 = vrot.lane.b32.xlu1 %v3646_v28, %s3281_s15 }
0x1189   :  { %1548 = vrot.lane.b32.xlu0 %v3646_v28, %s3278_s12 }
0x11ee   :  { %v1531_v21 = vpop.xlane.xlu1 %1530 }
0x11ef   :  { %v1533_v22 = vsub.f32 %v1523_v35, %v1531_v21 }
0x11f0   :  { %v1528_v48 = vpop.xlane.xlu0 %1527 }
0x11f1   :  { %v1536_v49 = vmul.f32 1.442695, %v1533_v22  ;;  %v1532_v50 = vsub.f32 %v1518_v39, %v1528_v48 }
0x11f2   :  { %v1551_v51 = vpop.permute.xlu1 %1550 }
0x11f3   :  { %3213 = vpow2.f32 %v1536_v49  ;;  %v1534_v52 = vmul.f32 1.442695, %v1532_v50  ;;  %3056 = vmatprep.subr.mxu0 %v1551_v51 }
0x11f4   :  { %3057 = vmatpush3.msra.mxu0 %v1551_v51 }
0x11f5   :  { %3215 = vpow2.f32 %v1534_v52 }
0x11f6   :  { %v1753_v59 = vpop.permute.xlu1 %1752 }
0x11f8   :  { %v1730_v53 = vpop.xlane.xlu0 %1729 }
0x11f9   :  { %v1734_v63 = vsub.f32 %v1720_v44, %v1730_v53 }
0x11fa   :  { %v1751_v4 = vpop.permute.xlu1 %1750 }
0x11fb   :  { %v1736_v0 = vmul.f32 1.442695, %v1734_v63 }
0x11fc   :  { %v1733_v54 = vpop.xlane.xlu0 %1732 }
0x11fd   :  { %v1735_v55 = vsub.f32 %v1725_v45, %v1733_v54  ;;  %v3254_v45 = vld [vmem:[%s3882_s2] sm:$0xff] }
0x11ff   :  { %v1738_v56 = vmul.f32 1.442695, %v1735_v55 }
0x1200   :  { %v3214_v8 = vpop.eup %3213  ;;  %v1549_v6 = vpop.permute.xlu0 %1548 }
0x1201   :  { %3217 = vpow2.f32 %v1738_v56  ;;  %3058 = vmatprep.subr.mxu0 %v1549_v6  ;;  %v1541_v57 = vsel %vm240_vm2, %v3214_v8, 0.0 }
0x1202   :  { %v3216_v58 = vpop.eup %3215  ;;  %1542 = vadd.xlane.f32.xlu0 %v1541_v57  ;;  %3059 = vmatpush3.msra.mxu0 %v1549_v6  ;;  %3219 = vpow2.f32 %v1736_v0 }
0x1203   :  { %3070 = vmatprep.subr.mxu0 %v1753_v59  ;;  %v1538_v60 = vsel %vm240_vm2, %v3216_v58, 0.0 }
0x1204   :  { %1539 = vadd.xlane.f32.xlu1 %v1538_v60 }
0x120e   :  { %v3218_v61 = vpop.eup %3217 }
0x120f   :  { %v1743_v62 = vsel %vm240_vm2, %v3218_v61, 0.0  ;;  %v3220_v1 = vpop.eup %3219 }
0x1210   :  { %1744 = vadd.xlane.f32.xlu0 %v1743_v62  ;;  %v1740_v3 = vsel %vm240_vm2, %v3220_v1, 0.0 }
0x1215   :  { %1851 = vrot.lane.b32.xlu1 %v3646_v28, %s3282_s16 }
0x1226   :  { %1853 = vrot.lane.b32.xlu0 %v3644_v26, %s3282_s16 }
0x122a   :  { %1847 = vrot.lane.b32.xlu0 %v3646_v28, %s3283_s17 }
0x1239   :  { %1741 = vadd.xlane.f32.xlu1 %v1740_v3 }
0x124a   :  { %1849 = vrot.lane.b32.xlu1 %v3644_v26, %s3283_s17 }
0x128b   :  { %v1543_v9 = vpop.xlane.xlu0 %1542 }
0x128c   :  { %3221 = vrcp.f32 %v1543_v9 }
0x128d   :  { %v1540_v13 = vpop.xlane.xlu1 %1539 }
0x128e   :  { %3223 = vrcp.f32 %v1540_v13 }
0x1291   :  { %v1852_v27 = vpop.permute.xlu1 %1851 }
0x1299   :  { %v3222_v14 = vpop.eup %3221  ;;  %v1745_v18 = vpop.xlane.xlu0 %1744 }
0x129a   :  { %v1547_v12 = vmul.f32 %v3222_v14, %v3214_v8  ;;  %3225 = vrcp.f32 %v1745_v18 }
0x129b   :  { %v3224_v16 = vpop.eup %3223 }
0x129c   :  { %v1546_v19 = vmul.f32 %v3224_v16, %v3216_v58 }
0x129d   :  { %v1854_v25 = vpop.permute.xlu0 %1853 }
0x129e   :  { %3060 = vmatprep.mubr.msk.f32.mxu0 %vm240_vm2, %v1546_v19 }
0x129f   :  { %3061 = vmatmul.mubr.msk.f32.vlgmr.msra.gmra.mxu0 %vm240_vm2, %v1547_v12 }
0x12a0   :  { %3071 = vmatpush3.msra.mxu0 %v1753_v59 }
0x12a1   :  { %3072 = vmatprep.subr.mxu0 %v1751_v4  ;;  %v1848_v33 = vpop.permute.xlu0 %1847 }
0x12a2   :  { %3073 = vmatpush3.msra.mxu0 %v1751_v4 }
0x12a3   :  { %3077 = vmatprep.subr.msk.mxu0 %vm156_vm1, %v1854_v25 }
0x12a7   :  { %v3226_v17 = vpop.eup %3225 }
0x12a8   :  { %v1749_v32 = vmul.f32 %v3226_v17, %v3218_v61 }
0x12c2   :  { %v1742_v11 = vpop.xlane.xlu1 %1741 }
0x12c3   :  { %3227 = vrcp.f32 %v1742_v11 }
0x12c6   :  { %v1850_v34 = vpop.permute.xlu1 %1849 }
0x12d0   :  { %v3228_v30 = vpop.eup %3227 }
0x12d1   :  { %v1748_v31 = vmul.f32 %v3228_v30, %v3220_v1 }
0x12d3   :  { %3074 = vmatprep.mubr.msk.f32.mxu0 %vm240_vm2, %v1748_v31 }
0x12d4   :  { %3075 = vmatmul.mubr.msk.f32.vlgmr.msra.gmra.mxu0 %vm240_vm2, %v1749_v32 }
0x12d5   :  { %3078 = vmatpush3.xpose.msk.msra.mxu0 %vm156_vm1, %v1854_v25  ;;  %3081 = vmatprep.mubr.msk.f32.mxu0 %vm156_vm1, %v1848_v33 }
0x12d6   :  { %3079 = vmatprep.subr.msk.mxu0 %vm156_vm1, %v1852_v27 }
0x12d9   :  { %3080 = vmatpush3.xpose.msk.msra.mxu0 %vm156_vm1, %v1852_v27 }
0x12dc   :  { %3082 = vmatmul.mubr.msk.f32.vlgmr.msra.gmra.mxu0 %vm156_vm1, %v1850_v34 }
0x135f   :  { %v3062_v35 = vpop.f32.mrf.mxu0 }
0x1360   :  { %1636 = vst.msk [vmem:[#allocation2 + $0x8] sm:$0xff] %vm156_vm1, %v3062_v35 }
0x1361   :  { %v1626_v36 = vpop.f32.mrf.mxu0 }
0x1362   :  { %1635 = vst.msk [vmem:[#allocation2] sm:$0xff] %vm156_vm1, %v1626_v36 }
0x1394   :  { %v3714_v39 = vpop.f32.mrf.mxu0 }
0x1396   :  { %v3716_v40 = vpop.f32.mrf.mxu0 }
0x139c   :  { %v3083_v41 = vpop.f32.mrf.mxu0 }
0x139d   :  { %v1935_v43 = vadd.f32 %v3253_v42, %v3083_v41 }
0x139e   :  { %v1929_v44 = vpop.f32.mrf.mxu0 }
0x139f   :  { %v1930_v46 = vadd.f32 %v3254_v45, %v1929_v44  ;;  %v1941_v47 = vsel %vm240_vm2, %v1935_v43, -inf }
0x13a0   :  { %1942 = vmax.xlane.f32.xlu1 %v1941_v47 }
0x13a1   :  { %v1938_v21 = vsel %vm240_vm2, %v1930_v46, -inf }
0x13a2   :  { %1939 = vmax.xlane.f32.xlu0 %v1938_v21 }
0x13b1   :  { %1962 = vrot.lane.b32.xlu1 %v3644_v26, %s3284_s18 }
0x13b5   :  { %2063 = vrot.lane.b32.xlu1 %v3644_v26, %s3285_s19 }
0x13b9   :  { %2061 = vrot.lane.b32.xlu1 %v3646_v28, %s3285_s19 }
0x13bd   :  { %2059 = vrot.lane.b32.xlu1 %v3644_v26, %s3286_s20 }
0x1429   :  { %v1943_v22 = vpop.xlane.xlu1 %1942 }
0x142a   :  { %v1945_v48 = vsub.f32 %v1935_v43, %v1943_v22  ;;  %v2754_v22 = vld [vmem:[%s3884_s4 + $0x30] sm:$0xff] }
0x142b   :  { %v1940_v49 = vpop.xlane.xlu0 %1939 }
0x142c   :  { %v1948_v50 = vmul.f32 1.442695, %v1945_v48  ;;  %v1944_v51 = vsub.f32 %v1930_v46, %v1940_v49  ;;  %v2753_v48 = vld [vmem:[%s3884_s4 + $0x28] sm:$0xff]  ;;  %v2752_v49 = vld [vmem:[%s3884_s4 + $0x20] sm:$0xff] }
0x142d   :  { %v1963_v52 = vpop.permute.xlu1 %1962 }
0x142e   :  { %3229 = vpow2.f32 %v1948_v50  ;;  %v1946_v53 = vmul.f32 1.442695, %v1944_v51  ;;  %3084 = vmatprep.subr.mxu1 %v1963_v52 }
0x142f   :  { %3085 = vmatpush3.msra.mxu1 %v1963_v52 }
0x1430   :  { %3231 = vpow2.f32 %v1946_v53 }
0x1431   :  { %v2064_v59 = vpop.permute.xlu1 %2063 }
0x1435   :  { %v2062_v1 = vpop.permute.xlu1 %2061 }
0x1439   :  { %v2060_v3 = vpop.permute.xlu1 %2059 }
0x143b   :  { %v3230_v54 = vpop.eup %3229 }
0x143c   :  { %v1953_v55 = vsel %vm240_vm2, %v3230_v54, 0.0 }
0x143d   :  { %v3232_v56 = vpop.eup %3231  ;;  %1954 = vadd.xlane.f32.xlu0 %v1953_v55 }
0x143e   :  { %v1950_v8 = vsel %vm240_vm2, %v3232_v56, 0.0 }
0x1441   :  { %1951 = vadd.xlane.f32.xlu0 %v1950_v8 }
0x1457   :  { %1960 = vrot.lane.b32.xlu0 %v3646_v28, %s3284_s18 }
0x145b   :  { %2057 = vrot.lane.b32.xlu0 %v3646_v28, %s3286_s20 }
0x14c6   :  { %v1955_v6 = vpop.xlane.xlu0 %1954 }
0x14c7   :  { %3233 = vrcp.f32 %v1955_v6 }
0x14ca   :  { %v1952_v57 = vpop.xlane.xlu0 %1951 }
0x14cb   :  { %3235 = vrcp.f32 %v1952_v57 }
0x14ce   :  { %v1961_v58 = vpop.permute.xlu0 %1960 }
0x14cf   :  { %3086 = vmatprep.subr.mxu1 %v1961_v58 }
0x14d0   :  { %3087 = vmatpush3.msra.mxu1 %v1961_v58 }
0x14d1   :  { %3091 = vmatprep.subr.msk.mxu1 %vm156_vm1, %v2064_v59 }
0x14d2   :  { %v2058_v0 = vpop.permute.xlu0 %2057 }
0x14d4   :  { %v3234_v60 = vpop.eup %3233 }
0x14d5   :  { %v1959_v63 = vmul.f32 %v3234_v60, %v3230_v54 }
0x14d8   :  { %v3236_v61 = vpop.eup %3235 }
0x14d9   :  { %v1958_v62 = vmul.f32 %v3236_v61, %v3232_v56  ;;  %v2272_v56 = vrot.slane %v3639_v24, %v989_v38 }
0x14db   :  { %3088 = vmatprep.mubr.msk.f32.mxu1 %vm240_vm2, %v1958_v62 }
0x14dc   :  { %3089 = vmatmul.mubr.msk.f32.vlgmr.msra.gmra.mxu1 %vm240_vm2, %v1959_v63 }
0x14dd   :  { %3092 = vmatpush3.xpose.msk.msra.mxu1 %vm156_vm1, %v2064_v59  ;;  %3095 = vmatprep.mubr.msk.f32.mxu1 %vm156_vm1, %v2058_v0 }
0x14de   :  { %3093 = vmatprep.subr.msk.mxu1 %vm156_vm1, %v2062_v1 }
0x14e1   :  { %3094 = vmatpush3.xpose.msk.msra.mxu1 %vm156_vm1, %v2062_v1 }
0x14e4   :  { %3096 = vmatmul.mubr.msk.f32.vlgmr.msra.gmra.mxu1 %vm156_vm1, %v2060_v3 }
0x159c   :  { %v3090_v4 = vpop.f32.mrf.mxu1 }
0x159e   :  { %v2038_v9 = vpop.f32.mrf.mxu1 }
0x15a4   :  { %v3097_v13 = vpop.f32.mrf.mxu1 }
0x15a5   :  { %v2145_v14 = vadd.f32 %v3253_v42, %v3097_v13 }
0x15a6   :  { %v2139_v16 = vpop.f32.mrf.mxu1 }
0x15a7   :  { %v2140_v18 = vadd.f32 %v3254_v45, %v2139_v16  ;;  %v2151_v19 = vsel %vm240_vm2, %v2145_v14, -inf  ;;  %v2758_v16 = vld [vmem:[%s3885_s5 + $0x30] sm:$0xff] }
0x15a8   :  { %2152 = vmax.xlane.f32.xlu1 %v2151_v19  ;;  %v2756_v19 = vld [vmem:[%s3885_s5 + $0x20] sm:$0xff] }
0x15a9   :  { %v2148_v12 = vsel %vm240_vm2, %v2140_v18, -inf }
0x15aa   :  { %2149 = vmax.xlane.f32.xlu0 %v2148_v12  ;;  %v2767_v12 = vld [vmem:[%s3886_s6 + $0x78] sm:$0xff] }
0x15b9   :  { %2172 = vrot.lane.b32.xlu1 %v3644_v26, %s3287_s21 }
0x15bd   :  { %1839 = vrot.lane.b32.xlu1 %v3716_v40, %s3288_s22 }
0x15c1   :  { %1841 = vrot.lane.b32.xlu1 %v3714_v39, %s3288_s22 }
0x15c5   :  { %2051 = vrot.lane.b32.xlu1 %v3090_v4, %s3289_s23 }
0x1631   :  { %v2153_v25 = vpop.xlane.xlu1 %2152 }
0x1632   :  { %v2155_v27 = vsub.f32 %v2145_v14, %v2153_v25  ;;  %v2766_v25 = vld [vmem:[%s3886_s6 + $0x70] sm:$0xff] }
0x1633   :  { %v2150_v11 = vpop.xlane.xlu0 %2149 }
0x1634   :  { %v2158_v17 = vmul.f32 1.442695, %v2155_v27  ;;  %v2154_v30 = vsub.f32 %v2140_v18, %v2150_v11  ;;  %v2757_v18 = vld [vmem:[%s3885_s5 + $0x28] sm:$0xff]  ;;  %v2764_v11 = vld [vmem:[%s3886_s6 + $0x60] sm:$0xff] }
0x1635   :  { %v2173_v31 = vpop.permute.xlu1 %2172  ;;  %v2765_v27 = vld [vmem:[%s3886_s6 + $0x68] sm:$0xff] }
0x1636   :  { %3237 = vpow2.f32 %v2158_v17  ;;  %v2156_v32 = vmul.f32 1.442695, %v2154_v30  ;;  %3098 = vmatprep.subr.mxu0 %v2173_v31 }
0x1637   :  { %3099 = vmatpush3.msra.mxu0 %v2173_v31 }
0x1638   :  { %3239 = vpow2.f32 %v2156_v32 }
0x1639   :  { %v1840_v26 = vpop.permute.xlu1 %1839 }
0x163a   :  { %1845 = vst.msk [vmem:[#allocation2] sm:$0xff] %vm560_vm3, %v1840_v26 }
0x163d   :  { %v1842_v33 = vpop.permute.xlu1 %1841 }
0x163e   :  { %1846 = vst.msk [vmem:[#allocation2 + $0x8] sm:$0xff] %vm560_vm3, %v1842_v33 }
0x1641   :  { %v2052_v34 = vpop.permute.xlu1 %2051 }
0x1642   :  { %2056 = vst.msk [vmem:[#allocation2 + $0x8] sm:$0xff] %vm771_vm4, %v2052_v34  ;;  %v2385_v34 = vrot.slane %v3639_v24, %v1103_v15  ;;  %v2763_v15 = vld [vmem:[%s3886_s6 + $0x58] sm:$0xff] }
0x1643   :  { %v3238_v35 = vpop.eup %3237 }
0x1644   :  { %v2163_v36 = vsel %vm240_vm2, %v3238_v35, 0.0 }
0x1645   :  { %v3240_v39 = vpop.eup %3239  ;;  %2164 = vadd.xlane.f32.xlu0 %v2163_v36 }
0x1646   :  { %v2160_v40 = vsel %vm240_vm2, %v3240_v39, 0.0 }
0x1649   :  { %2161 = vadd.xlane.f32.xlu0 %v2160_v40 }
0x165f   :  { %2170 = vrot.lane.b32.xlu0 %v3646_v28, %s3287_s21  ;;  %v2755_v28 = vld [vmem:[%s3884_s4 + $0x38] sm:$0xff] }
0x1663   :  { %2049 = vrot.lane.b32.xlu0 %v2038_v9, %s3289_s23 }
0x16ce   :  { %v2165_v41 = vpop.xlane.xlu0 %2164 }
0x16cf   :  { %3241 = vrcp.f32 %v2165_v41 }
0x16d2   :  { %v2162_v42 = vpop.xlane.xlu0 %2161 }
0x16d3   :  { %3243 = vrcp.f32 %v2162_v42 }
0x16d6   :  { %v2171_v43 = vpop.permute.xlu0 %2170 }
0x16d7   :  { %3100 = vmatprep.subr.mxu0 %v2171_v43 }
0x16d8   :  { %3101 = vmatpush3.msra.mxu0 %v2171_v43 }
0x16d9   :  { %3105 = vmatprep.subr.mxu0 %v2755_v28 }
0x16da   :  { %v2050_v44 = vpop.permute.xlu0 %2049 }
0x16db   :  { %2055 = vst.msk [vmem:[#allocation2] sm:$0xff] %vm771_vm4, %v2050_v44 }
0x16dc   :  { %v3242_v45 = vpop.eup %3241 }
0x16dd   :  { %v2169_v21 = vmul.f32 %v3242_v45, %v3238_v35 }
0x16e0   :  { %v3244_v46 = vpop.eup %3243 }
0x16e1   :  { %v2168_v47 = vmul.f32 %v3244_v46, %v3240_v39  ;;  %v2391_v39 = vrot.slane %v3639_v24, %v1109_v7  ;;  %v2762_v7 = vld [vmem:[%s3886_s6 + $0x50] sm:$0xff]  ;;  %v2761_v46 = vld [vmem:[%s3886_s6 + $0x48] sm:$0xff] }
0x16e3   :  { %3102 = vmatprep.mubr.msk.f32.mxu0 %vm240_vm2, %v2168_v47  ;;  %v2760_v47 = vld [vmem:[%s3886_s6 + $0x40] sm:$0xff] }
0x16e4   :  { %3103 = vmatmul.mubr.msk.f32.vlgmr.msra.gmra.mxu0 %vm240_vm2, %v2169_v21  ;;  %v2397_v21 = vrot.slane %v3639_v24, %v1115_v29 }
0x16e5   :  { %3106 = vmatpush3.msra.mxu0 %v2755_v28 }
0x16e6   :  { %3107 = vmatprep.subr.mxu0 %v2754_v22 }
0x16e7   :  { %3108 = vmatpush3.msra.mxu0 %v2754_v22 }
0x16e8   :  { %3109 = vmatprep.subr.mxu0 %v2753_v48 }
0x16e9   :  { %3110 = vmatpush3.msra.mxu0 %v2753_v48 }
0x16ea   :  { %3111 = vmatprep.subr.mxu0 %v2752_v49 }
0x16eb   :  { %3112 = vmatpush3.msra.mxu0 %v2752_v49 }
0x16ec   :  { %3127 = vmatprep.subr.mxu0 %v2767_v12 }
0x17a4   :  { %v3104_v50 = vpop.f32.mrf.mxu0 }
0x17a5   :  { %2261 = vrot.lane.b32.xlu1 %v3104_v50, %s3290_s11 }
0x17a6   :  { %v2248_v51 = vpop.f32.mrf.mxu0 }
0x17a7   :  { %2259 = vrot.lane.b32.xlu0 %v2248_v51, %s3290_s11 }
0x1817   :  { %v2262_v52 = vpop.permute.xlu1 %2261 }
0x1818   :  { %2266 = vst.msk [vmem:[#allocation2 + $0x8] sm:$0xff] %vm982_vm5, %v2262_v52  ;;  %v2484_v52 = vrot.slane %v3639_v24, %v1202_v37 }
0x1819   :  { %v2260_v53 = vpop.permute.xlu0 %2259 }
0x181a   :  { %2265 = vst.msk [vmem:[#allocation2] sm:$0xff] %vm982_vm5, %v2260_v53 }
0x181f   :  { %v2268_v55 = vld [vmem:[#allocation2 + $0x8] sm:$0xff] }
0x1821   :  { %v2267_v54 = vld [vmem:[#allocation2] sm:$0xff] }
0x1822   :  { %3113 = vmatprep.mubr.msk.f32.mxu0 %vm68_vm0, %v2267_v54 }
0x1823   :  { %3114 = vmatmul.mubr.msk.f32.vlgmr.msra.gmra.mxu0 %vm68_vm0, %v2268_v55 }
0x1824   :  { %3128 = vmatpush3.msra.mxu0 %v2767_v12 }
0x1825   :  { %3129 = vmatprep.subr.mxu0 %v2766_v25 }
0x1826   :  { %3130 = vmatpush3.msra.mxu0 %v2766_v25  ;;  %v2597_v25 = vrot.slane %v3639_v24, %v1316_v2 }
0x1827   :  { %3131 = vmatprep.subr.mxu0 %v2765_v27 }
0x1828   :  { %3132 = vmatpush3.msra.mxu0 %v2765_v27 }
0x1829   :  { %3133 = vmatprep.subr.mxu0 %v2764_v11 }
0x182a   :  { %3134 = vmatpush3.msra.mxu0 %v2764_v11 }
0x182b   :  { %3135 = vmatprep.subr.mxu0 %v2763_v15 }
0x182c   :  { %3136 = vmatpush3.msra.mxu0 %v2763_v15 }
0x182d   :  { %3137 = vmatprep.subr.mxu0 %v2762_v7 }
0x182e   :  { %3138 = vmatpush3.msra.mxu0 %v2762_v7 }
0x182f   :  { %3139 = vmatprep.subr.mxu0 %v2761_v46 }
0x1830   :  { %3140 = vmatpush3.msra.mxu0 %v2761_v46 }
0x1831   :  { %3141 = vmatprep.subr.mxu0 %v2760_v47 }
0x1832   :  { %3142 = vmatpush3.msra.mxu0 %v2760_v47 }
0x18e3   :  { %v3115_v8 = vpop.f32.mrf.mxu0 }
0x18e4   :  { %v2351_v6 = vadd.f32 %v3115_v8, %v2272_v56 }
0x18e5   :  { %v2345_v57 = vpop.f32.mrf.mxu0 }
0x18e6   :  { %v2355_v58 = vadd.f32 %v2351_v6, %v3630_v23  ;;  %v2346_v59 = vadd.f32 %v2345_v57, %v2272_v56 }
0x18e8   :  { %v2359_v60 = vsel %vm68_vm0, %v2355_v58, 0.0  ;;  %v2354_v61 = vadd.f32 %v2346_v59, %v3628_v20  ;;  %v2759_v20 = vld [vmem:[%s3885_s5 + $0x38] sm:$0xff] }
0x18e9   :  { %2360 = vadd.xlane.f32.xlu1 %v2359_v60  ;;  %3116 = vmatprep.subr.mxu1 %v2759_v20 }
0x18ea   :  { %v2356_v62 = vsel %vm68_vm0, %v2354_v61, 0.0  ;;  %3117 = vmatpush3.msra.mxu1 %v2759_v20 }
0x18eb   :  { %2357 = vadd.xlane.f32.xlu0 %v2356_v62  ;;  %3118 = vmatprep.subr.mxu1 %v2758_v16 }
0x18ec   :  { %3119 = vmatpush3.msra.mxu1 %v2758_v16 }
0x18ed   :  { %3120 = vmatprep.subr.mxu1 %v2757_v18 }
0x18ee   :  { %3121 = vmatpush3.msra.mxu1 %v2757_v18 }
0x18ef   :  { %3122 = vmatprep.subr.mxu1 %v2756_v19 }
0x18f0   :  { %3123 = vmatpush3.msra.mxu1 %v2756_v19 }
0x1972   :  { %v2361_v63 = vpop.xlane.xlu1 %2360 }
0x1973   :  { %v2363_v0 = vmul.f32 0.03125, %v2361_v63 }
0x1974   :  { %v2358_v1 = vpop.xlane.xlu0 %2357 }
0x1975   :  { %v2362_v3 = vmul.f32 0.03125, %v2358_v1  ;;  %v2365_v4 = vsub.f32 %v2355_v58, %v2363_v0 }
0x1977   :  { %v2364_v38 = vsub.f32 %v2354_v61, %v2362_v3  ;;  %v2367_v14 = vmul.f32 %v2365_v4, %v2365_v4 }
0x1979   :  { %v2366_v9 = vmul.f32 %v2364_v38, %v2364_v38  ;;  %v2371_v23 = vsel %vm68_vm0, %v2367_v14, 0.0 }
0x197b   :  { %v2368_v13 = vsel %vm68_vm0, %v2366_v9, 0.0  ;;  %v2607_v9 = vld [vmem:[%s3888_s8 + $0x8] sm:$0xff] }
0x197c   :  { %2369 = vadd.xlane.f32.xlu0 %v2368_v13  ;;  %v2606_v13 = vld [vmem:[%s3888_s8] sm:$0xff] }
0x1980   :  { %2372 = vadd.xlane.f32.xlu0 %v2371_v23 }
0x1a05   :  { %v2370_v17 = vpop.xlane.xlu0 %2369 }
0x1a06   :  { %v2374_v30 = vmul.f32 0.03125, %v2370_v17 }
0x1a08   :  { %v2376_v31 = vadd.f32 1e-05, %v2374_v30 }
0x1a09   :  { %v2373_v32 = vpop.xlane.xlu0 %2372 }
0x1a0a   :  { %3245 = vrsqrt.f32 %v2376_v31  ;;  %v2375_v26 = vmul.f32 0.03125, %v2373_v32  ;;  %v2603_v31 = vrot.slane %v3639_v24, %v1322_v5 }
0x1a0c   :  { %v2377_v33 = vadd.f32 1e-05, %v2375_v26 }
0x1a0e   :  { %3247 = vrsqrt.f32 %v2377_v33 }
0x1a17   :  { %v3246_v35 = vpop.eup %3245 }
0x1a18   :  { %v2380_v36 = vmul.f32 %v3246_v35, %v2364_v38  ;;  %v2608_v38 = vld [vmem:[%s3888_s8 + $0x10] sm:$0xff] }
0x1a1a   :  { %v2386_v40 = vmul.f32 %v2385_v34, %v2380_v36 }
0x1a1b   :  { %v3248_v41 = vpop.eup %3247 }
0x1a1c   :  { %v2381_v42 = vmul.f32 %v3248_v41, %v2365_v4  ;;  %v2392_v43 = vadd.f32 %v2391_v39, %v2386_v40  ;;  %v2609_v4 = vld [vmem:[%s3888_s8 + $0x18] sm:$0xff] }
0x1a1d   :  { %3146 = vmatprep.subr.mxu1 %v2609_v4 }
0x1a1e   :  { %v2387_v44 = vmul.f32 %v2385_v34, %v2381_v42  ;;  %3124 = vmatprep.mubr.msk.f32.mxu1 %vm68_vm0, %v2392_v43  ;;  %v2801_v34 = vld [vmem:[%s3889_s9] ss:$0 sm:$0xff] }
0x1a20   :  { %v2393_v45 = vadd.f32 %v2391_v39, %v2387_v44 }
0x1a22   :  { %3125 = vmatmul.mubr.msk.f32.vlgmr.msra.gmra.mxu1 %vm68_vm0, %v2393_v45 }
0x1a23   :  { %3147 = vmatpush3.msra.mxu1 %v2609_v4 }
0x1a24   :  { %3148 = vmatprep.subr.mxu1 %v2608_v38 }
0x1a25   :  { %3149 = vmatpush3.msra.mxu1 %v2608_v38 }
0x1a26   :  { %3150 = vmatprep.subr.mxu1 %v2607_v9 }
0x1a27   :  { %3151 = vmatpush3.msra.mxu1 %v2607_v9 }
0x1a28   :  { %3152 = vmatprep.subr.mxu1 %v2606_v13 }
0x1a29   :  { %3153 = vmatpush3.msra.mxu1 %v2606_v13 }
0x1ae2   :  { %v3126_v28 = vpop.f32.mrf.mxu1 }
0x1ae3   :  { %v2476_v22 = vadd.f32 %v3126_v28, %v2397_v21 }
0x1ae4   :  { %v2470_v48 = vpop.f32.mrf.mxu1 }
0x1ae5   :  { %v2471_v49 = vadd.f32 %v2470_v48, %v2397_v21  ;;  %v2480_v51 = vmax.f32 %v2476_v22, 0.0 }
0x1ae7   :  { %v2479_v50 = vmax.f32 %v2471_v49, 0.0 }
0x1ae9   :  { %3143 = vmatprep.mubr.msk.f32.mxu0 %vm1204_vm6, %v2479_v50 }
0x1aea   :  { %3144 = vmatmul.mubr.msk.f32.vlgmr.msra.gmra.mxu0 %vm1204_vm6, %v2480_v51 }
0x1baa   :  { %v3145_v53 = vpop.f32.mrf.mxu0 }
0x1bab   :  { %v2563_v54 = vadd.f32 %v3145_v53, %v2484_v52 }
0x1bac   :  { %v2557_v55 = vpop.f32.mrf.mxu0 }
0x1bad   :  { %v2558_v56 = vadd.f32 %v2557_v55, %v2484_v52  ;;  %v2567_v8 = vadd.f32 %v2563_v54, %v2393_v45 }
0x1baf   :  { %v2566_v29 = vadd.f32 %v2558_v56, %v2392_v43  ;;  %v2571_v6 = vsel %vm68_vm0, %v2567_v8, 0.0 }
0x1bb0   :  { %2572 = vadd.xlane.f32.xlu0 %v2571_v6 }
0x1bb1   :  { %v2568_v57 = vsel %vm68_vm0, %v2566_v29, 0.0 }
0x1bb2   :  { %2569 = vadd.xlane.f32.xlu1 %v2568_v57 }
0x1c39   :  { %v2573_v58 = vpop.xlane.xlu0 %2572 }
0x1c3a   :  { %v2575_v59 = vmul.f32 0.03125, %v2573_v58 }
0x1c3b   :  { %v2570_v60 = vpop.xlane.xlu1 %2569 }
0x1c3c   :  { %v2577_v61 = vsub.f32 %v2567_v8, %v2575_v59  ;;  %v2574_v62 = vmul.f32 0.03125, %v2570_v60 }
0x1c3e   :  { %v2576_v63 = vsub.f32 %v2566_v29, %v2574_v62  ;;  %v2579_v0 = vmul.f32 %v2577_v61, %v2577_v61 }
0x1c40   :  { %v2583_v37 = vsel %vm68_vm0, %v2579_v0, 0.0  ;;  %v2578_v1 = vmul.f32 %v2576_v63, %v2576_v63 }
0x1c41   :  { %2584 = vadd.xlane.f32.xlu0 %v2583_v37 }
0x1c42   :  { %v2580_v3 = vsel %vm68_vm0, %v2578_v1, 0.0 }
0x1c43   :  { %2581 = vadd.xlane.f32.xlu1 %v2580_v3 }
0x1cca   :  { %v2585_v14 = vpop.xlane.xlu0 %2584 }
0x1ccb   :  { %v2587_v23 = vmul.f32 0.03125, %v2585_v14 }
0x1ccc   :  { %v2582_v20 = vpop.xlane.xlu1 %2581 }
0x1ccd   :  { %v2589_v16 = vadd.f32 1e-05, %v2587_v23  ;;  %v2586_v18 = vmul.f32 0.03125, %v2582_v20 }
0x1ccf   :  { %3249 = vrsqrt.f32 %v2589_v16  ;;  %v2588_v19 = vadd.f32 1e-05, %v2586_v18 }
0x1cd1   :  { %3251 = vrsqrt.f32 %v2588_v19 }
0x1cdc   :  { %v3250_v12 = vpop.eup %3249 }
0x1cdd   :  { %v2593_v27 = vmul.f32 %v3250_v12, %v2577_v61 }
0x1cde   :  { %v3252_v11 = vpop.eup %3251 }
0x1cdf   :  { %v2592_v17 = vmul.f32 %v3252_v11, %v2576_v63  ;;  %v2599_v30 = vmul.f32 %v2597_v25, %v2593_v27 }
0x1ce1   :  { %v2598_v32 = vmul.f32 %v2597_v25, %v2592_v17  ;;  %v2605_v33 = vadd.f32 %v2603_v31, %v2599_v30 }
0x1ce3   :  { %v2604_v26 = vadd.f32 %v2603_v31, %v2598_v32 }
0x1ce5   :  { %3154 = vmatprep.mubr.msk.f32.mxu1 %vm68_vm0, %v2604_v26 }
0x1ce6   :  { %3155 = vmatmul.mubr.msk.f32.vlgmr.msra.gmra.mxu1 %vm68_vm0, %v2605_v33 }
0x1da6   :  { %v3156_v2 = vpop.f32.mrf.mxu1 }
0x1da7   :  { %v2695_v35 = vadd.f32 %v3156_v2, %v2801_v34 }
0x1da8   :  { %v2689_v36 = vpop.f32.mrf.mxu1 }
0x1da9   :  { %2699 = vst.msk [vmem:[#allocation3 + $0x8] sm:$0xff] %vm240_vm2, %v2695_v35  ;;  %v2690_v10 = vadd.f32 %v2801_v34, %v2689_v36 }
0x1dab   :  { %2698 = vst.msk [vmem:[#allocation3] sm:$0xff] %vm240_vm2, %v2690_v10 }
0x1dac   :  { %3266 = shalt.err (!%p3263_p4)
}
0x1dad   :  { %s3292_s29 = smov 128  }
0x1dae   :  { %2711 = dma.vmem_to_hbm [thread:$0]  %s2706_s1, 256, %s3890_s10, [#allocation4], %s3292_s29, %s3292_s29, %s3288_s22  }
0x1daf   :  { %3275 = dma.done.wait [#allocation4], 256  }
0x1db0   :  { %3276 = vsyncadd [#allocation4], 4294967040 }
0x1db1   :  { %2715 = vsyncpa [#allocation4], 1 }

</bundles_post_ra>
